<compile_context>
chip_gen: v7x
topology: tpu7x:2x2x1
jax: 0.10.0
libtpu: 0.0.40
codegen_flags: <defaults>
</compile_context>

<pallas_src>
import functools

import jax
import jax.numpy as jnp
from jax.experimental import pallas as pl
from jax.experimental.pallas import tpu as pltpu


# --------------------------------------------------------------------------
# Kernel
# --------------------------------------------------------------------------
def _graph_projector_kernel(x_ref, w1_ref, b1_ref, w2_ref, b2_ref,
                            w3_ref, b3_ref, o_ref, h_ref, *, cache_hidden):
    """Fused 3-layer MLP: relu(relu(x@W1+b1)@W2+b2)@W3+b3, f32 accumulation.

    Grid is (batch_block i, llm_block j).  When `cache_hidden` is True the
    layer-1/2 activation is computed only at j == 0 and cached in the VMEM
    scratch `h_ref` for the remaining llm_dim blocks of the same batch block.
    """
    cdt = w1_ref.dtype  # compute dtype for MXU inputs (f32 or bf16)

    def hidden_act():
        x = x_ref[...].astype(cdt)
        h = jnp.dot(x, w1_ref[...], preferred_element_type=jnp.float32)
        h = jnp.maximum(h + b1_ref[...].astype(jnp.float32), 0.0)   # ReLU (Dropout = id)
        h = jnp.dot(h.astype(cdt), w2_ref[...],
                    preferred_element_type=jnp.float32)
        h = jnp.maximum(h + b2_ref[...].astype(jnp.float32), 0.0)   # ReLU (Dropout = id)
        return h.astype(cdt)

    if cache_hidden:
        @pl.when(pl.program_id(1) == 0)
        def _():
            h_ref[...] = hidden_act()
        h = h_ref[...]
    else:
        h = hidden_act()

    out = jnp.dot(h, w3_ref[...], preferred_element_type=jnp.float32)
    o_ref[...] = (out + b3_ref[...].astype(jnp.float32)).astype(o_ref.dtype)


# --------------------------------------------------------------------------
# Helpers
# --------------------------------------------------------------------------
def _round_up(x, m):
    return ((x + m - 1) // m) * m


def _cdiv(a, b):
    return (a + b - 1) // b


def _pad_dim(a, axis, target):
    pad = target - a.shape[axis]
    if pad <= 0:
        return a
    widths = [(0, 0)] * a.ndim
    widths[axis] = (0, pad)
    return jnp.pad(a, widths)


def _tpu_info():
    """(vmem_capacity_bytes, wide_mxu, two_tensorcores) with safe fallbacks."""
    kind = ""
    try:
        kind = jax.devices()[0].device_kind.lower()
    except Exception:
        pass
    is_v7 = ("v7" in kind) or ("7x" in kind)
    wide_mxu = ("v6" in kind) or is_v7                 # 256-wide MXU
    two_tc = is_v7 or ("v5p" in kind) or ("v4" in kind)
    # Conservative default when the kind string is unknown.
    vmem = (64 << 20) if (is_v7 or not kind) else (128 << 20)
    try:
        q = int(pltpu.get_tpu_info().vmem_capacity_bytes)
        if q > (8 << 20):
            vmem = q
    except Exception:
        pass
    return vmem, wide_mxu, two_tc


# --------------------------------------------------------------------------
# Wrapper
# --------------------------------------------------------------------------
def graph_projector_forward(x, params, *, batch_tile=None, n_tile=None,
                            recompute_hidden=None):
    """Run the GraphProjector MLP via a single fused pallas_call.

    x: [batch, graph_dim] (f32 or bf16)
    params: dict with w1/b1, w2/b2, w3/b3 in [in, out] / [1, out] layout.
            Param dtype (f32 or bf16) sets the MXU compute dtype; accumulation
            is always f32.
    batch_tile / n_tile / recompute_hidden: optional overrides (testing).
    """
    w1, b1 = params["w1"], params["b1"]
    w2, b2 = params["w2"], params["b2"]
    w3, b3 = params["w3"], params["b3"]

    batch, graph_dim = x.shape
    hidden_dim = w1.shape[1]
    llm_dim = w3.shape[1]
    out_dtype = x.dtype
    p_dtype = w1.dtype

    # ---- pad feature dims to lane-dense multiples of 128 only when needed --
    # (zero-padding is exact: padded hidden cols get bias 0 -> relu 0 -> hit
    #  zero rows of the next weight; padded llm cols are sliced off.)
    graph_p = _round_up(graph_dim, 128)
    hidden_p = _round_up(hidden_dim, 128)
    llm_p = _round_up(llm_dim, 128)
    if graph_p != graph_dim:
        x = _pad_dim(x, 1, graph_p)
        w1 = _pad_dim(w1, 0, graph_p)
    if hidden_p != hidden_dim:
        w1 = _pad_dim(w1, 1, hidden_p)
        b1 = _pad_dim(b1, 1, hidden_p)
        w2 = _pad_dim(_pad_dim(w2, 0, hidden_p), 1, hidden_p)
        b2 = _pad_dim(b2, 1, hidden_p)
        w3 = _pad_dim(w3, 0, hidden_p)
    if llm_p != llm_dim:
        w3 = _pad_dim(w3, 1, llm_p)
        b3 = _pad_dim(b3, 1, llm_p)

    vmem_cap, wide_mxu, two_tc = _tpu_info()
    budget = int(0.85 * vmem_cap)     # generation-aware cap (v7x: ~54 MiB)

    p_sz = w1.dtype.itemsize
    x_sz = x.dtype.itemsize
    o_sz = jnp.dtype(out_dtype).itemsize

    def est_vmem(tile_, tn_, nb_):
        invariant = (graph_p * hidden_p + hidden_p * hidden_p
                     + 2 * hidden_p) * p_sz                # single-buffered
        w3_res = (1 if nb_ == 1 else 2) * (hidden_p * tn_ + tn_) * p_sz
        x_res = 2 * tile_ * graph_p * x_sz
        o_res = 2 * tile_ * tn_ * o_sz
        scratch = tile_ * hidden_p * p_sz
        temps = 2 * tile_ * max(hidden_p, tn_) * 4         # f32 intermediates
        return invariant + w3_res + x_res + o_res + scratch + temps + (2 << 20)

    # ---- batch tile ---------------------------------------------------------
    if batch_tile is not None:
        base = max(8, (int(batch_tile) // 8) * 8)
    else:
        base = 256 if (wide_mxu and batch >= 256) else 128
    tile = batch if batch <= base else base   # full-dim tile for small batches

    # ---- llm_dim tile (shrink until the VMEM budget is met) -----------------
    def fit_tn(tile_):
        if n_tile is not None:
            tn_ = min(_round_up(int(n_tile), 128), llm_p)
            return tn_, _cdiv(llm_p, tn_)
        tn_ = llm_p
        while tn_ > 128 and est_vmem(tile_, tn_, _cdiv(llm_p, tn_)) > budget:
            tn_ = max(128, _round_up(tn_ // 2, 128))
        return tn_, _cdiv(llm_p, tn_)

    tn, n_blocks = fit_tn(tile)
    if est_vmem(tile, tn, n_blocks) > budget and tile > 128 and batch > 128:
        tile = 128
        tn, n_blocks = fit_tn(tile)

    batch_blocks = _cdiv(batch, tile)

    # ---- v7x megacore: small batch -> split w3's N across the two TCs -------
    if (two_tc and batch_blocks == 1 and n_blocks == 1
            and llm_p >= 256 and n_tile is None):
        tn = _round_up(_cdiv(llm_p, 2), 128)
        n_blocks = _cdiv(llm_p, tn)

    if recompute_hidden is None:
        recompute = two_tc and batch_blocks == 1 and n_blocks >= 2
    else:
        recompute = bool(recompute_hidden)
    cache_hidden = (n_blocks > 1) and (not recompute)

    grid = (batch_blocks, n_blocks)
    dim_sem = ("parallel", "parallel" if recompute else "arbitrary")

    vmem_needed = est_vmem(tile, tn, n_blocks)
    vmem_limit = int(min(max(vmem_needed, 32 << 20), budget))

    # ---- cost estimate (helps XLA schedule around the custom call) ----------
    flops = 2 * batch * (graph_p * hidden_p + hidden_p * hidden_p
                         + hidden_p * llm_p)
    weight_bytes = sum(int(a.size) * a.dtype.itemsize
                       for a in (w1, b1, w2, b2, w3, b3))
    bytes_accessed = int(x.size) * x_sz + weight_bytes + batch * llm_p * o_sz
    cost = pl.CostEstimate(flops=flops, transcendentals=0,
                           bytes_accessed=bytes_accessed)

    # Grid-invariant weights/biases: constant block index, single-buffered.
    def invariant(shape):
        nd = len(shape)
        return pl.BlockSpec(shape, lambda i, j: (0,) * nd,
                            pipeline_mode=pl.Buffered(1))

    # w3/b3 stream along the inner llm axis (double-buffered) unless there is
    # only one llm block, in which case they are invariant too.
    stream_kw = {"pipeline_mode": pl.Buffered(1)} if n_blocks == 1 else {}

    kernel = functools.partial(_graph_projector_kernel,
                               cache_hidden=cache_hidden)

    out = pl.pallas_call(
        kernel,
        out_shape=jax.ShapeDtypeStruct((batch, llm_p), out_dtype),
        grid_spec=pltpu.PrefetchScalarGridSpec(
            num_scalar_prefetch=0,
            grid=grid,
            in_specs=[
                pl.BlockSpec((tile, graph_p), lambda i, j: (i, 0)),   # x tile
                invariant((graph_p, hidden_p)),                       # w1
                invariant((1, hidden_p)),                             # b1
                invariant((hidden_p, hidden_p)),                      # w2
                invariant((1, hidden_p)),                             # b2
                pl.BlockSpec((hidden_p, tn), lambda i, j: (0, j), **stream_kw),
                pl.BlockSpec((1, tn), lambda i, j: (0, j), **stream_kw),
            ],
            out_specs=pl.BlockSpec((tile, tn), lambda i, j: (i, j)),
            scratch_shapes=[pltpu.VMEM((tile, hidden_p), p_dtype)],
        ),
        compiler_params=pltpu.CompilerParams(
            dimension_semantics=dim_sem,
            vmem_limit_bytes=vmem_limit,
        ),
        cost_estimate=cost,
    )(x, w1, b1, w2, b2, w3, b3)

    return out[:, :llm_dim] if llm_p != llm_dim else out


# --------------------------------------------------------------------------
# Init / reference
# --------------------------------------------------------------------------
def xavier_uniform(key, fan_in, fan_out, dtype=jnp.float32):
    """Matches torch.nn.init.xavier_uniform_ for a Linear layer (in [in,out]
    layout; the bound depends only on fan_in + fan_out)."""
    bound = (6.0 / (fan_in + fan_out)) ** 0.5
    return jax.random.uniform(key, (fan_in, fan_out), dtype,
                              minval=-bound, maxval=bound)


def init_graph_projector_params(key, graph_dim, hidden_dim, llm_dim,
                                dtype=jnp.float32):
    k1, k2, k3 = jax.random.split(key, 3)
    return {
        "w1": xavier_uniform(k1, graph_dim, hidden_dim).astype(dtype),
        "b1": jnp.zeros((1, hidden_dim), dtype),
        "w2": xavier_uniform(k2, hidden_dim, hidden_dim).astype(dtype),
        "b2": jnp.zeros((1, hidden_dim), dtype),
        "w3": xavier_uniform(k3, hidden_dim, llm_dim).astype(dtype),
        "b3": jnp.zeros((1, llm_dim), dtype),
    }


def graph_projector_ref(x, params):
    """Pure-JAX f32 reference for correctness checking."""
    f32 = lambda a: a.astype(jnp.float32)
    h = jnp.maximum(f32(x) @ f32(params["w1"]) + f32(params["b1"]), 0.0)
    h = jnp.maximum(h @ f32(params["w2"]) + f32(params["b2"]), 0.0)
    return h @ f32(params["w3"]) + f32(params["b3"])


# --------------------------------------------------------------------------
# Self-test (small shapes)
# --------------------------------------------------------------------------
if __name__ == "__main__":
    graph_dim, hidden_dim, llm_dim = 128, 256, 512

    key = jax.random.PRNGKey(0)
    k_params, k_x = jax.random.split(key)
    params = init_graph_projector_params(k_params, graph_dim, hidden_dim, llm_dim)

    # 1) f32, batch 256: fused path (single llm block on 1-TC chips; auto
    #    llm split + recompute on 2-TC chips).
    batch = 256
    x = jax.random.normal(k_x, (batch, graph_dim), jnp.float32)
    out = jax.block_until_ready(graph_projector_forward(x, params))
    ref = graph_projector_ref(x, params)
    assert out.shape == (batch, llm_dim), out.shape
    assert jnp.allclose(out, ref, atol=1e-4, rtol=1e-4), "f32 mismatch vs reference"

    # 2) bf16 params + bf16 ragged batch (partial last block, no host padding),
    #    llm_dim forced into 2 blocks -> scratch-cached hidden path.
    params_bf16 = jax.tree_util.tree_map(lambda a: a.astype(jnp.bfloat16), params)
    x_ragged = x[:100].astype(jnp.bfloat16)
    out_bf16 = jax.block_until_ready(
        graph_projector_forward(x_ragged, params_bf16, n_tile=256))
    ref_bf16 = graph_projector_ref(x_ragged.astype(jnp.float32), params)
    assert out_bf16.shape == (100, llm_dim), out_bf16.shape
    err = float(jnp.max(jnp.abs(out_bf16.astype(jnp.float32) - ref_bf16)))
    scale = float(jnp.max(jnp.abs(ref_bf16))) + 1e-6
    assert err / scale < 5e-2, "bf16 mismatch vs f32 reference"

    # 3) tiny batch, llm split with recompute forced (the v7x megacore path,
    #    exercised here on any chip).
    x_small = x[:8]
    out_small = jax.block_until_ready(
        graph_projector_forward(x_small, params, n_tile=256,
                                recompute_hidden=True))
    ref_small = graph_projector_ref(x_small, params)
    assert out_small.shape == (8, llm_dim), out_small.shape
    assert jnp.allclose(out_small, ref_small, atol=1e-4, rtol=1e-4), \
        "recompute-path mismatch vs reference"

    print("KERNEL_OK")
</pallas_src>

<mosaic_0001>
module attributes {stable_mosaic.version = 11 : i64} {
  func.func @_graph_projector_kernel(%arg0: i32, %arg1: i32, %arg2: memref<128x128xf32, #tpu.memory_space<vmem>>, %arg3: memref<128x256xf32, #tpu.memory_space<vmem>>, %arg4: memref<1x256xf32, #tpu.memory_space<vmem>>, %arg5: memref<256x256xf32, #tpu.memory_space<vmem>>, %arg6: memref<1x256xf32, #tpu.memory_space<vmem>>, %arg7: memref<256x512xf32, #tpu.memory_space<vmem>>, %arg8: memref<1x512xf32, #tpu.memory_space<vmem>>, %arg9: memref<128x512xf32, #tpu.memory_space<vmem>>, %arg10: memref<128x256xf32, #tpu.memory_space<vmem>>) attributes {dimension_semantics = [#tpu.dimension_semantics<parallel>, #tpu.dimension_semantics<arbitrary>], iteration_bounds = array<i64: 2, 1>, scalar_prefetch = 0 : i64, scratch_operands = 1 : i64, tpu.core_type = #tpu.core_type<tc>, window_params = [{transform_indices = @transform_0, window_bounds = array<i64: 128, 128>}, {pipeline_mode = #tpu.pipeline_mode<synchronous>, transform_indices = @transform_1, window_bounds = array<i64: 128, 256>}, {pipeline_mode = #tpu.pipeline_mode<synchronous>, transform_indices = @transform_2, window_bounds = array<i64: 1, 256>}, {pipeline_mode = #tpu.pipeline_mode<synchronous>, transform_indices = @transform_3, window_bounds = array<i64: 256, 256>}, {pipeline_mode = #tpu.pipeline_mode<synchronous>, transform_indices = @transform_4, window_bounds = array<i64: 1, 256>}, {pipeline_mode = #tpu.pipeline_mode<synchronous>, transform_indices = @transform_5, window_bounds = array<i64: 256, 512>}, {pipeline_mode = #tpu.pipeline_mode<synchronous>, transform_indices = @transform_6, window_bounds = array<i64: 1, 512>}, {transform_indices = @transform_7, window_bounds = array<i64: 128, 512>}]} {
    %c0 = arith.constant 0 : index
    %c0_0 = arith.constant 0 : index
    %0 = vector.load %arg2[%c0, %c0_0] : memref<128x128xf32, #tpu.memory_space<vmem>>, vector<128x128xf32>
    %c0_1 = arith.constant 0 : index
    %c0_2 = arith.constant 0 : index
    %1 = vector.load %arg3[%c0_1, %c0_2] : memref<128x256xf32, #tpu.memory_space<vmem>>, vector<128x256xf32>
    %cst = arith.constant dense<0.000000e+00> : vector<128x256xf32>
    %2 = tpu.matmul %0, %1, %cst {dimension_numbers = #tpu.dot_dimension_numbers<[1], [0], [0], [1], [0, 0, 1, 1], [], []>} : vector<128x128xf32>, vector<128x256xf32>, vector<128x256xf32> -> vector<128x256xf32>
    %c0_3 = arith.constant 0 : index
    %c0_4 = arith.constant 0 : index
    %3 = vector.load %arg4[%c0_3, %c0_4] : memref<1x256xf32, #tpu.memory_space<vmem>>, vector<1x256xf32>
    %4 = vector.broadcast %3 : vector<1x256xf32> to vector<128x256xf32>
    %5 = arith.addf %2, %4 : vector<128x256xf32>
    %cst_5 = arith.constant 0.000000e+00 : f32
    %6 = vector.broadcast %cst_5 : f32 to vector<128x256xf32>
    %7 = arith.maximumf %5, %6 : vector<128x256xf32>
    %c0_6 = arith.constant 0 : index
    %c0_7 = arith.constant 0 : index
    %8 = vector.load %arg5[%c0_6, %c0_7] : memref<256x256xf32, #tpu.memory_space<vmem>>, vector<256x256xf32>
    %cst_8 = arith.constant dense<0.000000e+00> : vector<128x256xf32>
    %9 = tpu.matmul %7, %8, %cst_8 {dimension_numbers = #tpu.dot_dimension_numbers<[1], [0], [0], [1], [0, 0, 1, 1], [], []>} : vector<128x256xf32>, vector<256x256xf32>, vector<128x256xf32> -> vector<128x256xf32>
    %c0_9 = arith.constant 0 : index
    %c0_10 = arith.constant 0 : index
    %10 = vector.load %arg6[%c0_9, %c0_10] : memref<1x256xf32, #tpu.memory_space<vmem>>, vector<1x256xf32>
    %11 = vector.broadcast %10 : vector<1x256xf32> to vector<128x256xf32>
    %12 = arith.addf %9, %11 : vector<128x256xf32>
    %cst_11 = arith.constant 0.000000e+00 : f32
    %13 = vector.broadcast %cst_11 : f32 to vector<128x256xf32>
    %14 = arith.maximumf %12, %13 : vector<128x256xf32>
    %c0_12 = arith.constant 0 : index
    %c0_13 = arith.constant 0 : index
    %15 = vector.load %arg7[%c0_12, %c0_13] : memref<256x512xf32, #tpu.memory_space<vmem>>, vector<256x512xf32>
    %cst_14 = arith.constant dense<0.000000e+00> : vector<128x512xf32>
    %16 = tpu.matmul %14, %15, %cst_14 {dimension_numbers = #tpu.dot_dimension_numbers<[1], [0], [0], [1], [0, 0, 1, 1], [], []>} : vector<128x256xf32>, vector<256x512xf32>, vector<128x512xf32> -> vector<128x512xf32>
    %c0_15 = arith.constant 0 : index
    %c0_16 = arith.constant 0 : index
    %17 = vector.load %arg8[%c0_15, %c0_16] : memref<1x512xf32, #tpu.memory_space<vmem>>, vector<1x512xf32>
    %18 = vector.broadcast %17 : vector<1x512xf32> to vector<128x512xf32>
    %19 = arith.addf %16, %18 : vector<128x512xf32>
    %c0_17 = arith.constant 0 : index
    %c0_18 = arith.constant 0 : index
    %20 = vector.load %arg9[%c0_17, %c0_18] : memref<128x512xf32, #tpu.memory_space<vmem>>, vector<128x512xf32>
    tpu.vector_store %arg9[%c0_17, %c0_18], %19 {strides = array<i32>} : memref<128x512xf32, #tpu.memory_space<vmem>>, vector<128x512xf32>,
    return
  }
  func.func @transform_0(%arg0: i32, %arg1: i32) -> (i32, i32) {
    %c0_i32 = arith.constant 0 : i32
    %c0_i32_0 = arith.constant 0 : i32
    return %arg0, %c0_i32 : i32, i32
  }
  func.func @transform_1(%arg0: i32, %arg1: i32) -> (i32, i32) {
    %c0_i32 = arith.constant 0 : i32
    %c0_i32_0 = arith.constant 0 : i32
    %c0_i32_1 = arith.constant 0 : i32
    return %c0_i32, %c0_i32_0 : i32, i32
  }
  func.func @transform_2(%arg0: i32, %arg1: i32) -> (i32, i32) {
    %c0_i32 = arith.constant 0 : i32
    %c0_i32_0 = arith.constant 0 : i32
    %c0_i32_1 = arith.constant 0 : i32
    return %c0_i32, %c0_i32_0 : i32, i32
  }
  func.func @transform_3(%arg0: i32, %arg1: i32) -> (i32, i32) {
    %c0_i32 = arith.constant 0 : i32
    %c0_i32_0 = arith.constant 0 : i32
    %c0_i32_1 = arith.constant 0 : i32
    return %c0_i32, %c0_i32_0 : i32, i32
  }
  func.func @transform_4(%arg0: i32, %arg1: i32) -> (i32, i32) {
    %c0_i32 = arith.constant 0 : i32
    %c0_i32_0 = arith.constant 0 : i32
    %c0_i32_1 = arith.constant 0 : i32
    return %c0_i32, %c0_i32_0 : i32, i32
  }
  func.func @transform_5(%arg0: i32, %arg1: i32) -> (i32, i32) {
    %c0_i32 = arith.constant 0 : i32
    %c0_i32_0 = arith.constant 0 : i32
    return %c0_i32, %arg1 : i32, i32
  }
  func.func @transform_6(%arg0: i32, %arg1: i32) -> (i32, i32) {
    %c0_i32 = arith.constant 0 : i32
    %c0_i32_0 = arith.constant 0 : i32
    return %c0_i32, %arg1 : i32, i32
  }
  func.func @transform_7(%arg0: i32, %arg1: i32) -> (i32, i32) {
    %c0_i32 = arith.constant 0 : i32
    return %arg0, %arg1 : i32, i32
  }
}

</mosaic_0001>

<bundles_post_ra>
// kernel: tpu_custom_call.1
= control target key start
LH: loop header
LB: loop body
LE: loop exit
PB: predicated region body
PF: predicated region fallthrough
CT: control target
= control target key end

     0   :  { %s2967_s0 = inlined_call_operand.hbm [shape: f32[256,128], index: 0, kind: input, shape index: {}]   ;;  %s2968_s1 = inlined_call_operand.hbm [shape: f32[128,256], index: 1, kind: input, shape index: {}]   ;;  %s2969_s2 = inlined_call_operand.vmem [shape: f32[1,256], index: 2, kind: input, shape index: {}]   ;;  %s2970_s3 = inlined_call_operand.hbm [shape: f32[256,256], index: 3, kind: input, shape index: {}]   ;;  %s2971_s4 = inlined_call_operand.vmem [shape: f32[1,256], index: 4, kind: input, shape index: {}]   ;;  %s2972_s5 = inlined_call_operand.hbm [shape: f32[256,512], index: 5, kind: input, shape index: {}]   ;;  %s2973_s6 = inlined_call_operand.vmem [shape: f32[1,512], index: 6, kind: input, shape index: {}]   ;;  %s2974_s7 = inlined_call_operand.hbm [shape: f32[256,512], index: 7, kind: output, shape index: {}]  }
   0x1   :  { %2982 = sst [smem:[#allocation19_spill]] %s2974_s7 }
   0x2   :  { %12 = vsyncpa [#allocation4], 0 }
   0x3   :  { %14 = vsyncpa [#allocation4 + $0x1], 0 }
   0x4   :  { %15 = vsyncpa [#allocation7], 0 }
   0x5   :  { %16 = vsyncpa [#allocation10], 0 }
   0x6   :  { %17 = vsyncpa [#allocation5], 0 }
   0x7   :  { %19 = vsyncpa [#allocation5 + $0x1], 0  ;;  %s2232_s24 = smov 0   ;;  %s2234_s25 = smov 0  }
   0x8   :  { %s2236_s26 = smov 0   ;;  %s2238_s27 = smov 0  }
   0x9   :  { %s2240_s28 = smov 0   ;;  %s2242_s29 = smov 0  }
   0xa LB: > { %2983 = sst [smem:[#allocation16_spill]] %s2156_s24  ;;  %s1588_s30 = sadd.s32 4294967295, %s2176_s29   ;;  %s2176_s29 = sphi %s2242_s29, %s25_s29   ;;  %s2172_s28 = sphi %s2240_s28, %s3010_s28   ;;  %s2168_s27 = sphi %s2238_s27, %s3009_s27   ;;  %s2164_s26 = sphi %s2236_s26, %s3008_s26   ;;  %s2160_s25 = sphi %s2234_s25, %s3007_s25   ;;  %s2156_s24 = sphi %s2232_s24, %s3006_s24  }
   0xb   : > { %2984 = sst [smem:[#allocation17_spill]] %s2168_s27  ;;  %s1589_s8 = sadd.s32 4294967294, %s2176_s29  }
   0xc   : > { %p57_p0 = scmp.ne.s32.totalorder %s2160_s25, %s2156_s24  ;;  %p2266_p1 = scmp.eq.s32.totalorder %s1588_s30, 0 }
   0xd   : > { %p2270_p2 = scmp.eq.s32.totalorder %s1588_s30, 1  ;;  %p225_p3 = scmp.eq.s32.totalorder %s1589_s8, 1 }
   0xe   : > { %s2985_s9 = scalar_select %p2266_p1, 1, 0 }
   0xf   : > { %s2986_s10 = scalar_select %p2270_p2, 1, 0 }
  0x10   : > { %p2276_p4 = por %p2266_p1, %p57_p0  ;;  %p1590_p5 = scmp.ge.s32.totalorder %s2176_s29, 1 }
  0x11   : > { %p2281_p6 = por %p225_p3, %p57_p0  ;;  %p232_p7 = scmp.lt.s32.totalorder %s2176_s29, 3 }
  0x12   : > { %s2987_s11 = scalar_select %p2276_p4, 1, 0 }
  0x13   : > { %s2988_s12 = scalar_select %p2281_p6, 1, 0 }
  0x14   : > { %p2286_p8 = pnand %p1590_p5, %p232_p7  ;;  %s2178_s14 = smov [#allocation6]  }
  0x15   : > { %2989 = sst [smem:[#allocation18_spill]] %s2988_s12  ;;  %s244_s15 = sshll.u32 %s2178_s14, 4  ;;  %s2290_s15 = int_to_ptr.vmem [resolvable:$true] %s244_s15 }
  0x16   : > { %s2990_s13 = scalar_select %p2286_p8, 1, 0 }
  0x17   : > { %p1886_p9 = pneg %p2286_p8  ;;  %s2179_s17 = smov [#allocation8]  }
  0x18   : > { %s260_s18 = sshll.u32 %s2179_s17, 4  ;;  %s2180_s19 = smov [#allocation9]   ;;  %s2301_s18 = int_to_ptr.vmem [resolvable:$true] %s260_s18 }
  0x19   : > { %p2297_p11 = pnand %p1886_p9, %p2266_p1  ;;  %s2303_s20 = sshll.u32 %s2180_s19, 4  ;;  %s280_s20 = int_to_ptr.vmem [resolvable:$true] %s2303_s20 }
  0x1a   : > { %s1972_s23 = scalar_lea.hbm %s2968_s1, 4096 }
  0x1b   : > { %p1973_p12 = scmp.ne.s32.totalorder %s2968_s1, %s1972_s23  ;;  %p2313_p13 = pneg %p2297_p11 }
  0x1c   : > { %p1979_p5 = scmp.lt.u32.totalorder %s1972_s23, %s2968_s1 }
  0x1d   : > { %p1975_p0 = pnand %p2313_p13, %p1973_p12 }
  0x1f   : > { %p1976_p3 = pneg %p1975_p0 }
  0x21   : > { %p1981_p7 = pnand %p1979_p5, %p1976_p3 }
  0x23   : > { %1984 = shalt.err (!%p1981_p7)
}
  0x24   : > { %s1985_s21 = scalar_lea.vmem %s2290_s15, 4096  ;;  %p1993_p1 = scmp.lt.s32.totalorder %s2290_s15, %s2290_s15 }
  0x25   : > { %p1986_p9 = scmp.ne.s32.totalorder %s2290_s15, %s1985_s21  ;;  %p1994_p4 = scmp.lt.s32.totalorder %s1985_s21, %s1985_s21 }
  0x27   : > { %p1988_p10 = pnand %p1986_p9, %p2313_p13  ;;  %p1995_p12 = por %p1994_p4, %p1993_p1 }
  0x29   : > { %p1989_p6 = pneg %p1988_p10 }
  0x2b   : > { %p1996_p0 = pnand %p1995_p12, %p1989_p6 }
  0x2d   : > { %1999 = shalt.err (!%p1996_p0)
}
  0x2e   : > { %s2181_s22 = smov 256   ;;  %s2182_s23 = smov 16  }
  0x2f   : > { %1889 = dma.hbm_to_vmem [thread:$0]  (!%p2297_p11), %s2968_s1, 4096, %s2290_s15, [#allocation7], %s2181_s22, %s2181_s22, %s2182_s23  }
  0x30   : > { %s2000_s12 = scalar_lea.hbm %s2970_s3, 8192 }
  0x31   : > { %p2001_p1 = scmp.ne.s32.totalorder %s2970_s3, %s2000_s12  ;;  %p2007_p10 = scmp.lt.u32.totalorder %s2000_s12, %s2970_s3 }
  0x33   : > { %p2003_p4 = pnand %p2001_p1, %p2313_p13 }
  0x35   : > { %p2004_p6 = pneg %p2003_p4 }
  0x37   : > { %p2009_p3 = pnand %p2007_p10, %p2004_p6 }
  0x39   : > { %2012 = shalt.err (!%p2009_p3)
}
  0x3a   : > { %s2013_s15 = scalar_lea.vmem %s2301_s18, 8192  ;;  %p2021_p12 = scmp.lt.s32.totalorder %s2301_s18, %s2301_s18 }
  0x3b   : > { %p2014_p5 = scmp.ne.s32.totalorder %s2301_s18, %s2013_s15  ;;  %p2022_p0 = scmp.lt.s32.totalorder %s2013_s15, %s2013_s15 }
  0x3d   : > { %p2016_p7 = pnand %p2014_p5, %p2313_p13  ;;  %p2023_p1 = por %p2022_p0, %p2021_p12 }
  0x3f   : > { %p2017_p9 = pneg %p2016_p7 }
  0x41   : > { %p2024_p4 = pnand %p2023_p1, %p2017_p9 }
  0x43   : > { %2027 = shalt.err (!%p2024_p4)
}
  0x44   : > { %1892 = dma.hbm_to_vmem [thread:$0]  (!%p2297_p11), %s2970_s3, 8192, %s2301_s18, [#allocation7], %s2181_s22, %s2181_s22, %s2182_s23  }
  0x45   : > { %s2028_s30 = scalar_lea.hbm %s2972_s5, 16384 }
  0x46   : > { %p2029_p6 = scmp.ne.s32.totalorder %s2972_s5, %s2028_s30  ;;  %p2035_p5 = scmp.lt.u32.totalorder %s2028_s30, %s2972_s5 }
  0x48   : > { %p2031_p10 = pnand %p2029_p6, %p2313_p13 }
  0x4a   : > { %p2032_p3 = pneg %p2031_p10 }
  0x4c   : > { %p2037_p7 = pnand %p2035_p5, %p2032_p3 }
  0x4e   : > { %2040 = shalt.err (!%p2037_p7)
}
  0x4f   : > { %s2041_s15 = scalar_lea.vmem %s280_s20, 16384  ;;  %p2049_p1 = scmp.lt.s32.totalorder %s280_s20, %s280_s20 }
  0x50   : > { %p2042_p9 = scmp.ne.s32.totalorder %s280_s20, %s2041_s15  ;;  %p2050_p4 = scmp.lt.s32.totalorder %s2041_s15, %s2041_s15 }
  0x52   : > { %p2044_p12 = pnand %p2042_p9, %p2313_p13  ;;  %p2051_p8 = por %p2050_p4, %p2049_p1 }
  0x54   : > { %p2045_p0 = pneg %p2044_p12 }
  0x56   : > { %p2052_p2 = pnand %p2051_p8, %p2045_p0 }
  0x58   : > { %2055 = shalt.err (!%p2052_p2)
}
  0x59   : > { %s2183_s18 = smov 512   ;;  %s2184_s14 = smov 32  }
  0x5a   : > { %1895 = dma.hbm_to_vmem [thread:$0]  (!%p2297_p11), %s2972_s5, 16384, %s280_s20, [#allocation10], %s2183_s18, %s2183_s18, %s2184_s14  }
  0x5b   : > { %s44_s7 = sadd.s32 1, %s2164_s26  ;;  %s37_s24 = sadd.s32 1, %s2172_s28 }
  0x5c   : > { %p51_p2 = scmp.ne.s32.totalorder %s2164_s26, %s2160_s25  ;;  %p39_p8 = scmp.ge.s32.totalorder %s37_s24, 2 }
  0x5d   : > { %p52_p13 = scmp.eq.s32.totalorder %s2176_s29, 0  ;;  %p2993_p6 = scmp.ne.s32.totalorder %s2986_s10, 0 }
  0x5e   : > { %p1907_p3 = scmp.lt.s32.totalorder %s2176_s29, 2  ;;  %s3012_s24 = smov (%p39_p8, %s37_s24), 0 }
  0x5f   : > { %p2383_p10 = por %p2993_p6, %p51_p2  ;;  %p53_p5 = por %p52_p13, %p51_p2 }
  0x60   : > { %s301_s16 = sand.u32 1, %s2164_s26   ;;  %s41_s12 = ssub.s32 %s2172_s28, %s3012_s24 }
  0x61   : > { %p42_p7 = scmp.eq.s32.totalorder %s41_s12, 0  ;;  %s1596_s20 = sshll.u32 %s301_s16, 7 }
  0x62   : > { %s1611_s30 = sshll.u32 %s2172_s28, 11  ;;  %s305_s21 = scalar_lea.vmem [#allocation3], %s1596_s20 }
  0x63   : > { %s2395_s8 = scalar_select %p42_p7, %s2164_s26, %s44_s7  }
  0x64   : > { %s2400_s10 = scalar_lea.hbm %s2967_s0, %s1611_s30  ;;  %s312_s15 = sshll.u32 %s305_s21, 4  ;;  %s2402_s15 = int_to_ptr.vmem [resolvable:$true] %s312_s15 }
  0x65   : > { %p2406_p11 = pnand %p1907_p3, %p53_p5  ;;  %s2410_s14 = scalar_lea.sflag [#allocation4], %s301_s16 }
  0x66   : > { %s2056_s22 = scalar_lea.hbm %s2400_s10, 2048  ;;  %s2061_s12 = scalar_lea.hbm %s2967_s0, 4096 }
  0x67   : > { %p2057_p9 = scmp.ne.s32.totalorder %s2400_s10, %s2056_s22  ;;  %p2058_p12 = pneg %p2406_p11 }
  0x68   : > { %p2062_p4 = scmp.lt.u32.totalorder %s2400_s10, %s2967_s0  ;;  %p2063_p2 = scmp.lt.u32.totalorder %s2061_s12, %s2056_s22 }
  0x69   : > { %p2059_p0 = pnand %p2058_p12, %p2057_p9  ;;  %p2065_p13 = scmp.lt.u32.totalorder %s2056_s22, %s2400_s10 }
  0x6a   : > { %p2064_p8 = por %p2063_p2, %p2062_p4 }
  0x6b   : > { %p2060_p1 = pneg %p2059_p0 }
  0x6c   : > { %p2066_p6 = por %p2065_p13, %p2064_p8 }
  0x6e   : > { %p2067_p3 = pnand %p2066_p6, %p2060_p1 }
  0x70   : > { %2070 = shalt.err (!%p2067_p3)
}
  0x71   : > { %s2071_s16 = scalar_lea.vmem %s2402_s15, 2048  ;;  %s2185_s17 = smov [#allocation3]  }
  0x72   : > { %p2072_p5 = scmp.ne.s32.totalorder %s2402_s15, %s2071_s16  ;;  %s2076_s19 = sshll.u32 %s2185_s17, 4  ;;  %s2077_s19 = int_to_ptr.vmem [resolvable:$false] %s2076_s19 }
  0x73   : > { %s2078_s21 = scalar_lea.vmem %s2077_s19, 4096  ;;  %p2079_p0 = scmp.lt.s32.totalorder %s2402_s15, %s2077_s19 }
  0x74   : > { %p2074_p7 = pnand %p2072_p5, %p2058_p12  ;;  %p2080_p4 = scmp.lt.s32.totalorder %s2078_s21, %s2071_s16 }
  0x76   : > { %p2075_p9 = pneg %p2074_p7  ;;  %p2081_p2 = por %p2080_p4, %p2079_p0 }
  0x78   : > { %p2082_p8 = pnand %p2081_p2, %p2075_p9 }
  0x7a   : > { %2085 = shalt.err (!%p2082_p8)
}
  0x7b   : > { %s2186_s22 = smov 128   ;;  %s2187_s23 = smov 8  }
  0x7c   : > { %1899 = dma.hbm_to_vmem [thread:$0]  (!%p2406_p11), %s2400_s10, 2048, %s2402_s15, %s2410_s14, %s2186_s22, %s2186_s22, %s2187_s23  }
  0x7d   : > { %p2996_p12 = scmp.ne.s32.totalorder %s2990_s13, 0 }
  0x7e   : > { %s2441_s7 = sand.u32 (!%p2996_p12), 1, %s2160_s25   ;;  %p2997_p1 = scmp.ne.s32.totalorder (!%p2996_p12), %s2987_s11, 0 }
  0x7f   : > { %324 = sbr.rel (%p2996_p12) target bundleno = 917 (0x395), region = 48  ;;  %s1600_s12 = sshll.u32 (!%p2996_p12), %s2441_s7, 7 }
  0x80   : > { %s327_s20 = scalar_lea.sflag (!%p2996_p12), [#allocation4], %s2441_s7  ;;  %s2445_s30 = scalar_lea.vmem (!%p2996_p12), [#allocation3], %s1600_s12 }
  0x86   : > { %2139 = dma.done.wait (%p2997_p1), %s327_s20, 2048  }
  0x87   : > { %2141 = vsyncadd (%p2997_p1), %s327_s20, 4294965248  ;;  %p2998_p11 = scmp.ne.s32.totalorder %s2985_s9, 0 }
  0x89   : > { %2143 = dma.done.wait (%p2998_p11), [#allocation7], 12288  }
  0x8a   : > { %2145 = vsyncadd (%p2998_p11), [#allocation7], 4294955008 }
  0x8b   : > { %2147 = dma.done.wait (%p2998_p11), [#allocation10], 16384  }
  0x8c   : > { %2149 = vsyncadd (%p2998_p11), [#allocation10], 4294950912  ;;  %v2188_v0 = vmov 0.0   ;;  %v403_v1 = vld [vmem:[#allocation6 + $0x8] sm:$0xff]  ;;  %v405_v2 = vld [vmem:[#allocation6 + $0x18] sm:$0xff]  ;;  %s1604_s14 = sshll.u32 %s2441_s7, 9 }
  0x8d   : > { %510 = vmatprep.mubr.f32.mxu0 %v2188_v0  ;;  %v402_v3 = vld [vmem:[#allocation6] sm:$0xff]  ;;  %v1614_v4 = vpack.c.bf16 %v405_v2, %v403_v1  ;;  %v404_v5 = vld [vmem:[#allocation6 + $0x10] sm:$0xff]  ;;  %v407_v6 = vld [vmem:[#allocation6 + $0x28] sm:$0xff]  ;;  %s2777_s16 = scalar_lea.vmem [#allocation11], %s1604_s14  ;;  %s2999_s17 = sld [smem:[#allocation17_spill]] }
  0x8e   : > { %v409_v7 = vld [vmem:[#allocation6 + $0x38] sm:$0xff]  ;;  %v1616_v8 = vpack.c.bf16 %v404_v5, %v402_v3  ;;  %v406_v10 = vld [vmem:[#allocation6 + $0x20] sm:$0xff]  ;;  %v408_v11 = vld [vmem:[#allocation6 + $0x30] sm:$0xff]  ;;  %s1461_s21 = sshll.u32 %s2777_s16, 4  ;;  %s3000_s12 = sld [smem:[#allocation19_spill]]  ;;  %s2915_s21 = int_to_ptr.vmem [resolvable:$true] %s1461_s21 }
  0x8f   : > { %v1618_v9 = vpack.c.bf16 %v409_v7, %v407_v6  ;;  %v411_v12 = vld [vmem:[#allocation6 + $0x48] sm:$0xff]  ;;  %1615 = vmatprep.subr.bf16.mxu0 %v1614_v4  ;;  %v413_v13 = vld [vmem:[#allocation6 + $0x58] sm:$0xff]  ;;  %v1620_v14 = vpack.c.bf16 %v408_v11, %v406_v10  ;;  %v410_v16 = vld [vmem:[#allocation6 + $0x40] sm:$0xff]  ;;  %s2086_s9 = scalar_lea.vmem %s2915_s21, 8192  ;;  %s2189_s11 = smov [#allocation11]  }
  0x90   : > { %1617 = vmatpush1.bf16.msra.mxu0 %v1616_v8  ;;  %v1622_v15 = vpack.c.bf16 %v413_v13, %v411_v12  ;;  %v412_v17 = vld [vmem:[#allocation6 + $0x50] sm:$0xff]  ;;  %v415_v18 = vld [vmem:[#allocation6 + $0x68] sm:$0xff]  ;;  %v417_v19 = vld [vmem:[#allocation6 + $0x78] sm:$0xff]  ;;  %p2087_p13 = scmp.ne.s32.totalorder %s2915_s21, %s2086_s9  ;;  %s2090_s13 = sshll.u32 %s2189_s11, 4  ;;  %s2091_s13 = int_to_ptr.vmem [resolvable:$false] %s2090_s13 }
  0x91   : > { %1619 = vmatprep.subr.bf16.mxu0 %v1618_v9  ;;  %v1624_v20 = vpack.c.bf16 %v412_v17, %v410_v16  ;;  %v1626_v21 = vpack.c.bf16 %v417_v19, %v415_v18  ;;  %v414_v22 = vld [vmem:[#allocation6 + $0x60] sm:$0xff]  ;;  %v416_v23 = vld [vmem:[#allocation6 + $0x70] sm:$0xff]  ;;  %v419_v24 = vld [vmem:[#allocation6 + $0x88] sm:$0xff]  ;;  %s2092_s10 = scalar_lea.vmem %s2091_s13, 16384  ;;  %p2093_p5 = scmp.lt.s32.totalorder %s2915_s21, %s2091_s13 }
  0x92   : > { %v421_v25 = vld [vmem:[#allocation6 + $0x98] sm:$0xff]  ;;  %v1628_v26 = vpack.c.bf16 %v416_v23, %v414_v22  ;;  %v418_v28 = vld [vmem:[#allocation6 + $0x80] sm:$0xff]  ;;  %v420_v29 = vld [vmem:[#allocation6 + $0x90] sm:$0xff]  ;;  %p2088_p6 = pnand %p2087_p13, %p2383_p10  ;;  %p2094_p7 = scmp.lt.s32.totalorder %s2092_s10, %s2086_s9 }
  0x93   : > { %v1630_v27 = vpack.c.bf16 %v421_v25, %v419_v24  ;;  %v423_v30 = vld [vmem:[#allocation6 + $0xa8] sm:$0xff]  ;;  %v425_v31 = vld [vmem:[#allocation6 + $0xb8] sm:$0xff]  ;;  %v422_v32 = vld [vmem:[#allocation6 + $0xa0] sm:$0xff]  ;;  %v1632_v34 = vpack.c.bf16 %v420_v29, %v418_v28  ;;  %s1613_s19 = sshll.u32 %s2999_s17, 13 }
  0x94   : > { %1621 = vmatpush1.bf16.msra.mxu0 %v1620_v14  ;;  %v424_v33 = vld [vmem:[#allocation6 + $0xb0] sm:$0xff]  ;;  %v427_v35 = vld [vmem:[#allocation6 + $0xc8] sm:$0xff]  ;;  %v429_v36 = vld [vmem:[#allocation6 + $0xd8] sm:$0xff]  ;;  %v1634_v40 = vpack.c.bf16 %v425_v31, %v423_v30  ;;  %s2913_s20 = scalar_lea.hbm %s3000_s12, %s1613_s19  ;;  %p2089_p3 = pneg %p2088_p6 }
  0x95   : > { %1623 = vmatprep.subr.bf16.mxu0 %v1622_v15  ;;  %v640_v37 = vld [vmem:[#allocation8 + $0x8] sm:$0xff]  ;;  %v642_v38 = vld [vmem:[#allocation8 + $0x18] sm:$0xff]  ;;  %v639_v39 = vld [vmem:[#allocation8] sm:$0xff]  ;;  %v1636_v51 = vpack.c.bf16 %v424_v33, %v422_v32  ;;  %v1638_v55 = vpack.c.bf16 %v429_v36, %v427_v35  ;;  %p2095_p9 = por %p2094_p7, %p2093_p5 }
  0x96   : > { %v1646_v41 = vpack.c.bf16 %v642_v38, %v640_v37  ;;  %v641_v42 = vld [vmem:[#allocation8 + $0x10] sm:$0xff]  ;;  %v644_v43 = vld [vmem:[#allocation8 + $0x28] sm:$0xff]  ;;  %v646_v44 = vld [vmem:[#allocation8 + $0x38] sm:$0xff] }
  0x97   : > { %v1648_v45 = vpack.c.bf16 %v641_v42, %v639_v39  ;;  %v1650_v46 = vpack.c.bf16 %v646_v44, %v644_v43  ;;  %v643_v47 = vld [vmem:[#allocation8 + $0x20] sm:$0xff]  ;;  %v645_v48 = vld [vmem:[#allocation8 + $0x30] sm:$0xff]  ;;  %v648_v49 = vld [vmem:[#allocation8 + $0x48] sm:$0xff]  ;;  %p2096_p0 = pnand %p2095_p9, %p2089_p3 }
  0x98   : > { %1625 = vmatpush1.bf16.msra.mxu0 %v1624_v20  ;;  %1647 = vmatprep.subr.bf16.mxu1 %v1646_v41  ;;  %v650_v50 = vld [vmem:[#allocation8 + $0x58] sm:$0xff]  ;;  %v426_v52 = vld [vmem:[#allocation6 + $0xc0] sm:$0xff]  ;;  %v428_v53 = vld [vmem:[#allocation6 + $0xd0] sm:$0xff]  ;;  %v1652_v54 = vpack.c.bf16 %v645_v48, %v643_v47 }
  0x99   : > { %1627 = vmatprep.subr.bf16.mxu0 %v1626_v21  ;;  %1649 = vmatpush1.bf16.msra.mxu1 %v1648_v45  ;;  %v431_v56 = vld [vmem:[#allocation6 + $0xe8] sm:$0xff]  ;;  %v1654_v57 = vpack.c.bf16 %v650_v50, %v648_v49  ;;  %v647_v58 = vld [vmem:[#allocation8 + $0x40] sm:$0xff]  ;;  %v649_v59 = vld [vmem:[#allocation8 + $0x50] sm:$0xff]  ;;  %v1640_v63 = vpack.c.bf16 %v428_v53, %v426_v52 }
  0x9a   : > { %1651 = vmatprep.subr.bf16.mxu1 %v1650_v46  ;;  %v433_v60 = vld [vmem:[#allocation6 + $0xf8] sm:$0xff]  ;;  %v652_v61 = vld [vmem:[#allocation8 + $0x68] sm:$0xff]  ;;  %v430_v1 = vld [vmem:[#allocation6 + $0xe0] sm:$0xff]  ;;  %v1656_v2 = vpack.c.bf16 %v649_v59, %v647_v58 }
  0x9b   : > { %v654_v62 = vld [vmem:[#allocation8 + $0x78] sm:$0xff]  ;;  %v1642_v3 = vpack.c.bf16 %v433_v60, %v431_v56  ;;  %v432_v4 = vld [vmem:[#allocation6 + $0xf0] sm:$0xff]  ;;  %v651_v6 = vld [vmem:[#allocation8 + $0x60] sm:$0xff] }
  0x9c   : > { %1629 = vmatpush1.bf16.msra.mxu0 %v1628_v26  ;;  %v1658_v5 = vpack.c.bf16 %v654_v62, %v652_v61  ;;  %v653_v7 = vld [vmem:[#allocation8 + $0x70] sm:$0xff]  ;;  %v656_v8 = vld [vmem:[#allocation8 + $0x88] sm:$0xff]  ;;  %v658_v9 = vld [vmem:[#allocation8 + $0x98] sm:$0xff]  ;;  %v1644_v10 = vpack.c.bf16 %v432_v4, %v430_v1 }
  0x9d   : > { %1631 = vmatprep.subr.bf16.mxu0 %v1630_v27  ;;  %1653 = vmatpush1.bf16.msra.mxu1 %v1652_v54  ;;  %v1660_v11 = vpack.c.bf16 %v653_v7, %v651_v6  ;;  %v1662_v12 = vpack.c.bf16 %v658_v9, %v656_v8  ;;  %v655_v13 = vld [vmem:[#allocation8 + $0x80] sm:$0xff]  ;;  %v657_v14 = vld [vmem:[#allocation8 + $0x90] sm:$0xff]  ;;  %v660_v15 = vld [vmem:[#allocation8 + $0xa8] sm:$0xff] }
  0x9e   : > { %1655 = vmatprep.subr.bf16.mxu1 %v1654_v57  ;;  %v662_v16 = vld [vmem:[#allocation8 + $0xb8] sm:$0xff]  ;;  %v386_v17 = vld [vmem:[%s2445_s30] sm:$0xff]  ;;  %v1664_v18 = vpack.c.bf16 %v657_v14, %v655_v13  ;;  %v661_v21 = vld [vmem:[#allocation8 + $0xb0] sm:$0xff] }
  0x9f   : > { %v1666_v19 = vpack.c.bf16 %v662_v16, %v660_v15  ;;  %v659_v20 = vld [vmem:[#allocation8 + $0xa0] sm:$0xff]  ;;  %v664_v22 = vld [vmem:[#allocation8 + $0xc8] sm:$0xff]  ;;  %v666_v23 = vld [vmem:[#allocation8 + $0xd8] sm:$0xff] }
  0xa0   : > { %1633 = vmatpush1.bf16.msra.mxu0 %v1632_v34  ;;  %v387_v24 = vld [vmem:[%s2445_s30 + $0x8] sm:$0xff]  ;;  %v1668_v25 = vpack.c.bf16 %v661_v21, %v659_v20  ;;  %v1670_v26 = vpack.c.bf16 %v666_v23, %v664_v22  ;;  %v663_v27 = vld [vmem:[#allocation8 + $0xc0] sm:$0xff]  ;;  %v665_v28 = vld [vmem:[#allocation8 + $0xd0] sm:$0xff] }
  0xa1   : > { %1635 = vmatprep.subr.bf16.mxu0 %v1634_v40  ;;  %1657 = vmatpush1.bf16.msra.mxu1 %v1656_v2  ;;  %v668_v29 = vld [vmem:[#allocation8 + $0xe8] sm:$0xff]  ;;  %v670_v30 = vld [vmem:[#allocation8 + $0xf8] sm:$0xff]  ;;  %v388_v31 = vld [vmem:[%s2445_s30 + $0x10] sm:$0xff]  ;;  %v1672_v32 = vpack.c.bf16 %v665_v28, %v663_v27 }
  0xa2   : > { %1659 = vmatprep.subr.bf16.mxu1 %v1658_v5  ;;  %v1674_v33 = vpack.c.bf16 %v670_v30, %v668_v29  ;;  %v667_v34 = vld [vmem:[#allocation8 + $0xe0] sm:$0xff]  ;;  %v669_v35 = vld [vmem:[#allocation8 + $0xf0] sm:$0xff]  ;;  %v672_v36 = vld [vmem:[#allocation8 + $0x108] sm:$0xff] }
  0xa3   : > { %v674_v37 = vld [vmem:[#allocation8 + $0x118] sm:$0xff]  ;;  %v1676_v39 = vpack.c.bf16 %v669_v35, %v667_v34  ;;  %v671_v41 = vld [vmem:[#allocation8 + $0x100] sm:$0xff]  ;;  %v673_v42 = vld [vmem:[#allocation8 + $0x110] sm:$0xff] }
  0xa4   : > { %1637 = vmatpush1.bf16.msra.mxu0 %v1636_v51  ;;  %v389_v38 = vld [vmem:[%s2445_s30 + $0x18] sm:$0xff]  ;;  %v1678_v40 = vpack.c.bf16 %v674_v37, %v672_v36  ;;  %v676_v43 = vld [vmem:[#allocation8 + $0x128] sm:$0xff]  ;;  %v390_v45 = vld [vmem:[%s2445_s30 + $0x20] sm:$0xff]  ;;  %v1680_v46 = vpack.c.bf16 %v673_v42, %v671_v41 }
  0xa5   : > { %1639 = vmatprep.subr.bf16.mxu0 %v1638_v55  ;;  %1661 = vmatpush1.bf16.msra.mxu1 %v1660_v11  ;;  %v678_v44 = vld [vmem:[#allocation8 + $0x138] sm:$0xff]  ;;  %v675_v48 = vld [vmem:[#allocation8 + $0x120] sm:$0xff]  ;;  %v677_v49 = vld [vmem:[#allocation8 + $0x130] sm:$0xff] }
  0xa6   : > { %1663 = vmatprep.subr.bf16.mxu1 %v1662_v12  ;;  %v1682_v47 = vpack.c.bf16 %v678_v44, %v676_v43  ;;  %v680_v50 = vld [vmem:[#allocation8 + $0x148] sm:$0xff]  ;;  %v682_v51 = vld [vmem:[#allocation8 + $0x158] sm:$0xff]  ;;  %v1684_v53 = vpack.c.bf16 %v677_v49, %v675_v48  ;;  %v679_v55 = vld [vmem:[#allocation8 + $0x140] sm:$0xff] }
  0xa7   : > { %v391_v52 = vld [vmem:[%s2445_s30 + $0x28] sm:$0xff]  ;;  %v1686_v54 = vpack.c.bf16 %v682_v51, %v680_v50  ;;  %v681_v56 = vld [vmem:[#allocation8 + $0x150] sm:$0xff]  ;;  %v686_v58 = vld [vmem:[#allocation8 + $0x178] sm:$0xff] }
  0xa8   : > { %1641 = vmatpush1.bf16.msra.mxu0 %v1640_v63  ;;  %v684_v57 = vld [vmem:[#allocation8 + $0x168] sm:$0xff]  ;;  %v392_v59 = vld [vmem:[%s2445_s30 + $0x30] sm:$0xff]  ;;  %v1688_v60 = vpack.c.bf16 %v681_v56, %v679_v55  ;;  %v683_v62 = vld [vmem:[#allocation8 + $0x160] sm:$0xff] }
  0xa9   : > { %1643 = vmatprep.subr.bf16.mxu0 %v1642_v3  ;;  %1665 = vmatpush1.bf16.msra.mxu1 %v1664_v18  ;;  %v1690_v61 = vpack.c.bf16 %v686_v58, %v684_v57  ;;  %v685_v63 = vld [vmem:[#allocation8 + $0x170] sm:$0xff]  ;;  %v688_v1 = vld [vmem:[#allocation8 + $0x188] sm:$0xff]  ;;  %v690_v2 = vld [vmem:[#allocation8 + $0x198] sm:$0xff] }
  0xaa   : > { %1667 = vmatprep.subr.bf16.mxu1 %v1666_v19  ;;  %v393_v3 = vld [vmem:[%s2445_s30 + $0x38] sm:$0xff]  ;;  %v1692_v4 = vpack.c.bf16 %v685_v63, %v683_v62  ;;  %v1694_v5 = vpack.c.bf16 %v690_v2, %v688_v1  ;;  %v687_v6 = vld [vmem:[#allocation8 + $0x180] sm:$0xff]  ;;  %v689_v7 = vld [vmem:[#allocation8 + $0x190] sm:$0xff] }
  0xab   : > { %v692_v8 = vld [vmem:[#allocation8 + $0x1a8] sm:$0xff]  ;;  %v694_v9 = vld [vmem:[#allocation8 + $0x1b8] sm:$0xff]  ;;  %v1696_v11 = vpack.c.bf16 %v689_v7, %v687_v6  ;;  %v691_v13 = vld [vmem:[#allocation8 + $0x1a0] sm:$0xff] }
  0xac   : > { %1645 = vmatpush1.bf16.msra.mxu0 %v1644_v10  ;;  %v394_v10 = vld [vmem:[%s2445_s30 + $0x40] sm:$0xff]  ;;  %v1698_v12 = vpack.c.bf16 %v694_v9, %v692_v8  ;;  %v693_v14 = vld [vmem:[#allocation8 + $0x1b0] sm:$0xff]  ;;  %v696_v15 = vld [vmem:[#allocation8 + $0x1c8] sm:$0xff] }
  0xad   : > { %1669 = vmatpush1.bf16.msra.mxu1 %v1668_v25  ;;  %v698_v16 = vld [vmem:[#allocation8 + $0x1d8] sm:$0xff]  ;;  %v1700_v18 = vpack.c.bf16 %v693_v14, %v691_v13  ;;  %v396_v20 = vld [vmem:[%s2445_s30 + $0x50] sm:$0xff]  ;;  %v398_v22 = vld [vmem:[%s2445_s30 + $0x60] sm:$0xff] }
  0xae   : > { %1671 = vmatprep.subr.bf16.mxu1 %v1670_v26  ;;  %v1702_v19 = vpack.c.bf16 %v698_v16, %v696_v15  ;;  %v397_v21 = vld [vmem:[%s2445_s30 + $0x58] sm:$0xff]  ;;  %v399_v23 = vld [vmem:[%s2445_s30 + $0x68] sm:$0xff]  ;;  %v695_v26 = vld [vmem:[#allocation8 + $0x1c0] sm:$0xff] }
  0xaf   : > { %511 = vmatmul.mubr.f32.vlgmr.msra.gmra.mrb[0].mxu0 %v386_v17  ;;  %v395_v17 = vld [vmem:[%s2445_s30 + $0x48] sm:$0xff]  ;;  %v401_v25 = vld [vmem:[%s2445_s30 + $0x78] sm:$0xff]  ;;  %v697_v27 = vld [vmem:[#allocation8 + $0x1d0] sm:$0xff] }
  0xb0   : > { %516 = vmatprep.mubr.f32.mxu0 %v2188_v0  ;;  %v1704_v28 = vpack.c.bf16 %v697_v27, %v695_v26  ;;  %v700_v29 = vld [vmem:[#allocation8 + $0x1e8] sm:$0xff]  ;;  %v702_v30 = vld [vmem:[#allocation8 + $0x1f8] sm:$0xff]  ;;  %v908_v37 = vld [vmem:[#allocation9] sm:$0xff] }
  0xb1   : > { %1673 = vmatpush1.bf16.msra.mxu1 %v1672_v32  ;;  %v699_v32 = vld [vmem:[#allocation8 + $0x1e0] sm:$0xff]  ;;  %v909_v35 = vld [vmem:[#allocation9 + $0x8] sm:$0xff] }
  0xb2   : > { %1675 = vmatprep.subr.bf16.mxu1 %v1674_v33  ;;  %v701_v33 = vld [vmem:[#allocation8 + $0x1f0] sm:$0xff]  ;;  %v913_v36 = vld [vmem:[#allocation9 + $0x28] sm:$0xff]  ;;  %v916_v43 = vld [vmem:[#allocation9 + $0x40] sm:$0xff] }
  0xb3   : > { %517 = vmatmul.mubr.f32.gmra.mrb[2].mxu0 %v387_v24  ;;  %v400_v24 = vld [vmem:[%s2445_s30 + $0x70] sm:$0xff]  ;;  %v1708_v34 = vpack.c.bf16 %v701_v33, %v699_v32  ;;  %v920_v44 = vld [vmem:[#allocation9 + $0x60] sm:$0xff]  ;;  %v933_v51 = vld [vmem:[#allocation9 + $0xc8] sm:$0xff]  ;;  %s1445_s30 = scalar_lea.sflag [#allocation5], %s2441_s7 }
  0xb4   : > { %522 = vmatprep.mubr.f32.mxu0 %v2188_v0  ;;  %v924_v49 = vld [vmem:[#allocation9 + $0x80] sm:$0xff]  ;;  %v957_v9 = vld [vmem:[#allocation9 + $0x188] sm:$0xff] }
  0xb5   : > { %1677 = vmatpush1.bf16.msra.mxu1 %v1676_v39  ;;  %v912_v39 = vld [vmem:[#allocation9 + $0x20] sm:$0xff]  ;;  %v965_v15 = vld [vmem:[#allocation9 + $0x1c8] sm:$0xff] }
  0xb6   : > { %1679 = vmatprep.subr.bf16.mxu1 %v1678_v40  ;;  %v921_v40 = vld [vmem:[#allocation9 + $0x68] sm:$0xff]  ;;  %v1712_v41 = vpack.c.bf16 %v912_v39, %v908_v37  ;;  %v928_v50 = vld [vmem:[#allocation9 + $0xa0] sm:$0xff] }
  0xb7   : > { %523 = vmatmul.mubr.f32.gmra.mrb[4].mxu0 %v388_v31  ;;  %v1706_v31 = vpack.c.bf16 %v702_v30, %v700_v29  ;;  %v1720_v55 = vpack.c.bf16 %v928_v50, %v924_v49  ;;  %v932_v58 = vld [vmem:[#allocation9 + $0xc0] sm:$0xff]  ;;  %v969_v16 = vld [vmem:[#allocation9 + $0x1e8] sm:$0xff]  ;;  %v436_v50 = vlaneseq }
  0xb8   : > { %528 = vmatprep.mubr.f32.mxu0 %v2188_v0  ;;  %v940_v1 = vld [vmem:[#allocation9 + $0x100] sm:$0xff]  ;;  %v981_v27 = vld [vmem:[#allocation9 + $0x248] sm:$0xff] }
  0xb9   : > { %1681 = vmatpush1.bf16.msra.mxu1 %v1680_v46  ;;  %v929_v46 = vld [vmem:[#allocation9 + $0xa8] sm:$0xff]  ;;  %v944_v2 = vld [vmem:[#allocation9 + $0x120] sm:$0xff] }
  0xba   : > { %1683 = vmatprep.subr.bf16.mxu1 %v1682_v47  ;;  %v1716_v47 = vpack.c.bf16 %v920_v44, %v916_v43  ;;  %v948_v7 = vld [vmem:[#allocation9 + $0x140] sm:$0xff]  ;;  %v989_v33 = vld [vmem:[#allocation9 + $0x288] sm:$0xff] }
  0xbb   : > { %529 = vmatmul.mubr.f32.gmra.mrb[6].mxu0 %v389_v38  ;;  %v1710_v38 = vpack.c.bf16 %v913_v36, %v909_v35  ;;  %v952_v8 = vld [vmem:[#allocation9 + $0x160] sm:$0xff]  ;;  %v997_v39 = vld [vmem:[#allocation9 + $0x2c8] sm:$0xff] }
  0xbc   : > { %534 = vmatprep.mubr.f32.mxu0 %v2188_v0  ;;  %v956_v13 = vld [vmem:[#allocation9 + $0x180] sm:$0xff]  ;;  %v1005_v44 = vld [vmem:[#allocation9 + $0x308] sm:$0xff] }
  0xbd   : > { %1685 = vmatpush1.bf16.msra.mxu1 %v1684_v53  ;;  %1711 = vmatprep.subr.bf16.mxu0 %v1710_v38  ;;  %v911_v53 = vld [vmem:[#allocation9 + $0x18] sm:$0xff]  ;;  %v960_v14 = vld [vmem:[#allocation9 + $0x1a0] sm:$0xff] }
  0xbe   : > { %1687 = vmatprep.subr.bf16.mxu1 %v1686_v54  ;;  %1713 = vmatpush1.bf16.msra.mxu0 %v1712_v41  ;;  %v915_v54 = vld [vmem:[#allocation9 + $0x38] sm:$0xff]  ;;  %v976_v26 = vld [vmem:[#allocation9 + $0x220] sm:$0xff] }
  0xbf   : > { %535 = vmatmul.mubr.f32.gmra.mrb[8].mxu0 %v390_v45  ;;  %v925_v45 = vld [vmem:[#allocation9 + $0x88] sm:$0xff]  ;;  %v2491_v56 = vpack.c.bf16 %v915_v54, %v911_v53  ;;  %v984_v32 = vld [vmem:[#allocation9 + $0x260] sm:$0xff] }
  0xc0   : > { %540 = vmatprep.mubr.f32.mxu0 %v2188_v0  ;;  %v1718_v48 = vpack.c.bf16 %v929_v46, %v925_v45  ;;  %v988_v37 = vld [vmem:[#allocation9 + $0x280] sm:$0xff]  ;;  %v1009_v45 = vld [vmem:[#allocation9 + $0x328] sm:$0xff] }
  0xc1   : > { %1689 = vmatpush1.bf16.msra.mxu1 %v1688_v60  ;;  %v941_v60 = vld [vmem:[#allocation9 + $0x108] sm:$0xff]  ;;  %v992_v38 = vld [vmem:[#allocation9 + $0x2a0] sm:$0xff] }
  0xc2   : > { %1691 = vmatprep.subr.bf16.mxu1 %v1690_v61  ;;  %v945_v61 = vld [vmem:[#allocation9 + $0x128] sm:$0xff]  ;;  %v1000_v43 = vld [vmem:[#allocation9 + $0x2e0] sm:$0xff] }
  0xc3   : > { %541 = vmatmul.mubr.f32.gmra.mrb[10].mxu0 %v391_v52  ;;  %v937_v52 = vld [vmem:[#allocation9 + $0xe8] sm:$0xff]  ;;  %v1726_v63 = vpack.c.bf16 %v945_v61, %v941_v60  ;;  %v1008_v49 = vld [vmem:[#allocation9 + $0x320] sm:$0xff] }
  0xc4   : > { %546 = vmatprep.mubr.f32.mxu0 %v2188_v0  ;;  %v1722_v57 = vpack.c.bf16 %v937_v52, %v933_v51  ;;  %v1013_v51 = vld [vmem:[#allocation9 + $0x348] sm:$0xff] }
  0xc5   : > { %1693 = vmatpush1.bf16.msra.mxu1 %v1692_v4  ;;  %v953_v4 = vld [vmem:[#allocation9 + $0x168] sm:$0xff] }
  0xc6   : > { %1695 = vmatprep.subr.bf16.mxu1 %v1694_v5  ;;  %v1728_v5 = vpack.c.bf16 %v944_v2, %v940_v1  ;;  %v1017_v52 = vld [vmem:[#allocation9 + $0x368] sm:$0xff]  ;;  %v1024_v1 = vld [vmem:[#allocation9 + $0x3a0] sm:$0xff] }
  0xc7   : > { %547 = vmatmul.mubr.f32.gmra.mrb[12].mxu0 %v392_v59  ;;  %v936_v59 = vld [vmem:[#allocation9 + $0xe0] sm:$0xff]  ;;  %v1762_v54 = vpack.c.bf16 %v1017_v52, %v1013_v51  ;;  %v1025_v60 = vld [vmem:[#allocation9 + $0x3a8] sm:$0xff] }
  0xc8   : > { %552 = vmatprep.mubr.f32.mxu0 %v2188_v0  ;;  %v1724_v62 = vpack.c.bf16 %v936_v59, %v932_v58  ;;  %v2494_v58 = vshrl.u32 %v436_v50, 7  ;;  %v1021_v59 = vld [vmem:[#allocation9 + $0x388] sm:$0xff]  ;;  %v947_v50 = vld [vmem:[#allocation9 + $0x138] sm:$0xff] }
  0xc9   : > { %1697 = vmatpush1.bf16.msra.mxu1 %v1696_v11  ;;  %v1732_v11 = vpack.c.bf16 %v952_v8, %v948_v7 }
  0xca   : > { %1699 = vmatprep.subr.bf16.mxu1 %v1698_v12  ;;  %v2497_v2 = vsub.s32 0, %v2494_v58 }
  0xcb   : > { %553 = vmatmul.mubr.f32.gmra.mrb[14].mxu0 %v393_v3  ;;  %v949_v3 = vld [vmem:[#allocation9 + $0x148] sm:$0xff] }
  0xcc   : > { %558 = vmatprep.mubr.f32.mxu0 %v2188_v0  ;;  %v1730_v6 = vpack.c.bf16 %v953_v4, %v949_v3  ;;  %v434_v3 = vld [vmem:[%s2969_s2] sm:$0x3]  ;;  %v2503_v4 = vsub.s32 1, %v2494_v58 }
  0xcd   : > { %1701 = vmatpush1.bf16.msra.mxu1 %v1700_v18  ;;  %v1738_v18 = vpack.c.bf16 %v969_v16, %v965_v15  ;;  %v923_v15 = vld [vmem:[#allocation9 + $0x78] sm:$0xff] }
  0xce   : > { %1703 = vmatprep.subr.bf16.mxu1 %v1702_v19  ;;  %v964_v19 = vld [vmem:[#allocation9 + $0x1c0] sm:$0xff]  ;;  %v2509_v7 = vrot.slane %v434_v3, %v2503_v4 }
  0xcf   : > { %559 = vmatmul.mubr.f32.gmra.mrb[16].mxu0 %v394_v10  ;;  %v961_v10 = vld [vmem:[#allocation9 + $0x1a8] sm:$0xff] }
  0xd0   : > { %564 = vmatprep.mubr.f32.mxu0 %v2188_v0  ;;  %v1734_v12 = vpack.c.bf16 %v961_v10, %v957_v9 }
  0xd1   : > { %1705 = vmatpush1.bf16.msra.mxu1 %v1704_v28  ;;  %v985_v28 = vld [vmem:[#allocation9 + $0x268] sm:$0xff] }
  0xd2   : > { %1707 = vmatprep.subr.bf16.mxu1 %v1706_v31  ;;  %v1746_v30 = vpack.c.bf16 %v985_v28, %v981_v27  ;;  %v980_v31 = vld [vmem:[#allocation9 + $0x240] sm:$0xff]  ;;  %v931_v27 = vld [vmem:[#allocation9 + $0xb8] sm:$0xff] }
  0xd3   : > { %565 = vmatmul.mubr.f32.gmra.mrb[18].mxu0 %v395_v17  ;;  %v1736_v17 = vpack.c.bf16 %v960_v14, %v956_v13  ;;  %v1748_v35 = vpack.c.bf16 %v984_v32, %v980_v31  ;;  %v919_v14 = vld [vmem:[#allocation9 + $0x58] sm:$0xff] }
  0xd4   : > { %570 = vmatprep.mubr.f32.mxu0 %v2188_v0 }
  0xd5   : > { %1709 = vmatpush1.bf16.msra.mxu1 %v1708_v34  ;;  %v993_v34 = vld [vmem:[#allocation9 + $0x2a8] sm:$0xff] }
  0xd6   : > { %1838 = vmatprep.subr.bf16.mxu1 %v2491_v56  ;;  %v1750_v36 = vpack.c.bf16 %v993_v34, %v989_v33 }
  0xd7   : > { %571 = vmatmul.mubr.f32.gmra.mrb[20].mxu0 %v396_v20  ;;  %v968_v20 = vld [vmem:[#allocation9 + $0x1e0] sm:$0xff] }
  0xd8   : > { %576 = vmatprep.mubr.f32.mxu0 %v2188_v0 }
  0xdb   : > { %577 = vmatmul.mubr.f32.gmra.mrb[22].mxu0 %v397_v21  ;;  %v973_v21 = vld [vmem:[#allocation9 + $0x208] sm:$0xff] }
  0xdc   : > { %582 = vmatprep.mubr.f32.mxu0 %v2188_v0 }
  0xdf   : > { %583 = vmatmul.mubr.f32.gmra.mrb[24].mxu0 %v398_v22  ;;  %v977_v22 = vld [vmem:[#allocation9 + $0x228] sm:$0xff] }
  0xe0   : > { %588 = vmatprep.mubr.f32.mxu0 %v2188_v0 }
  0xe3   : > { %589 = vmatmul.mubr.f32.gmra.mrb[26].mxu0 %v399_v23  ;;  %v1740_v23 = vpack.c.bf16 %v968_v20, %v964_v19 }
  0xe4   : > { %594 = vmatprep.mubr.f32.mxu0 %v2188_v0 }
  0xe7   : > { %595 = vmatmul.mubr.f32.gmra.mrb[28].mxu0 %v400_v24  ;;  %v1742_v24 = vpack.c.bf16 %v977_v22, %v973_v21  ;;  %v2516_v22 = vpack.c.bf16 %v923_v15, %v919_v14  ;;  %v954_v14 = vld [vmem:[#allocation9 + $0x170] sm:$0xff] }
  0xe8   : > { %600 = vmatprep.mubr.f32.mxu0 %v2188_v0  ;;  %v917_v0 = vld [vmem:[#allocation9 + $0x48] sm:$0xff] }
  0xe9   : > { %v1714_v42 = vpack.c.bf16 %v921_v40, %v917_v0  ;;  %v1001_v0 = vld [vmem:[#allocation9 + $0x2e8] sm:$0xff]  ;;  %v1752_v40 = vpack.c.bf16 %v992_v38, %v988_v37  ;;  %v935_v38 = vld [vmem:[#allocation9 + $0xd8] sm:$0xff] }
  0xea   : > { %v1754_v41 = vpack.c.bf16 %v1001_v0, %v997_v39  ;;  %v939_v39 = vld [vmem:[#allocation9 + $0xf8] sm:$0xff] }
  0xeb   : > { %601 = vmatmul.mubr.f32.gmra.mrb[30].mxu0 %v401_v25  ;;  %1715 = vmatprep.subr.bf16.mxu0 %v1714_v42  ;;  %v972_v25 = vld [vmem:[#allocation9 + $0x200] sm:$0xff] }
  0xec   : > { %1717 = vmatpush1.bf16.msra.mxu0 %v1716_v47  ;;  %v1744_v29 = vpack.c.bf16 %v976_v26, %v972_v25  ;;  %v996_v42 = vld [vmem:[#allocation9 + $0x2c0] sm:$0xff]  ;;  %v1758_v47 = vpack.c.bf16 %v1009_v45, %v1005_v44  ;;  %v927_v26 = vld [vmem:[#allocation9 + $0x98] sm:$0xff]  ;;  %v2532_v45 = vpack.c.bf16 %v939_v39, %v935_v38 }
  0xed   : > { %1719 = vmatprep.subr.bf16.mxu0 %v1718_v48  ;;  %v1756_v46 = vpack.c.bf16 %v1000_v43, %v996_v42  ;;  %v1004_v48 = vld [vmem:[#allocation9 + $0x300] sm:$0xff]  ;;  %v2524_v34 = vpack.c.bf16 %v931_v27, %v927_v26  ;;  %v958_v27 = vld [vmem:[#allocation9 + $0x190] sm:$0xff] }
  0xee   : > { %v1760_v53 = vpack.c.bf16 %v1008_v49, %v1004_v48  ;;  %v943_v49 = vld [vmem:[#allocation9 + $0x118] sm:$0xff] }
  0xf0   : > { %1721 = vmatpush1.bf16.msra.mxu0 %v1720_v55  ;;  %v1012_v55 = vld [vmem:[#allocation9 + $0x340] sm:$0xff] }
  0xf1   : > { %1723 = vmatprep.subr.bf16.mxu0 %v1722_v57  ;;  %v1016_v57 = vld [vmem:[#allocation9 + $0x360] sm:$0xff] }
  0xf2   : > { %v1764_v61 = vpack.c.bf16 %v1016_v57, %v1012_v55 }
  0xf4   : > { %1725 = vmatpush1.bf16.msra.mxu0 %v1724_v62  ;;  %v1766_v62 = vpack.c.bf16 %v1025_v60, %v1021_v59  ;;  %v2540_v59 = vpack.c.bf16 %v947_v50, %v943_v49  ;;  %v942_v60 = vld [vmem:[#allocation9 + $0x110] sm:$0xff] }
  0xf5   : > { %1727 = vmatprep.subr.bf16.mxu0 %v1726_v63  ;;  %v1020_v63 = vld [vmem:[#allocation9 + $0x380] sm:$0xff] }
  0xf8   : > { %1729 = vmatpush1.bf16.msra.mxu0 %v1728_v5  ;;  %v1768_v5 = vpack.c.bf16 %v1024_v1, %v1020_v63  ;;  %v951_v63 = vld [vmem:[#allocation9 + $0x158] sm:$0xff] }
  0xf9   : > { %1731 = vmatprep.subr.bf16.mxu0 %v1730_v6  ;;  %v2506_v6 = vrot.slane %v434_v3, %v2497_v2  ;;  %v955_v1 = vld [vmem:[#allocation9 + $0x178] sm:$0xff] }
  0xfc   : > { %1733 = vmatpush1.bf16.msra.mxu0 %v1732_v11  ;;  %v910_v11 = vld [vmem:[#allocation9 + $0x10] sm:$0xff] }
  0xfd   : > { %1735 = vmatprep.subr.bf16.mxu0 %v1734_v12  ;;  %v914_v12 = vld [vmem:[#allocation9 + $0x30] sm:$0xff] }
 0x100   : > { %1737 = vmatpush1.bf16.msra.mxu0 %v1736_v17 }
 0x101   : > { %1739 = vmatprep.subr.bf16.mxu0 %v1738_v18  ;;  %v2513_v18 = vpack.c.bf16 %v914_v12, %v910_v11  ;;  %v2548_v12 = vpack.c.bf16 %v955_v1, %v951_v63 }
 0x104   : > { %1741 = vmatpush1.bf16.msra.mxu0 %v1740_v23  ;;  %v918_v23 = vld [vmem:[#allocation9 + $0x50] sm:$0xff] }
 0x105   : > { %1743 = vmatprep.subr.bf16.mxu0 %v1742_v24  ;;  %v922_v24 = vld [vmem:[#allocation9 + $0x70] sm:$0xff] }
 0x108   : > { %1745 = vmatpush1.bf16.msra.mxu0 %v1744_v29 }
 0x109   : > { %1747 = vmatprep.subr.bf16.mxu0 %v1746_v30  ;;  %v2520_v30 = vpack.c.bf16 %v922_v24, %v918_v23 }
 0x10c   : > { %1749 = vmatpush1.bf16.msra.mxu0 %v1748_v35  ;;  %v926_v35 = vld [vmem:[#allocation9 + $0x90] sm:$0xff] }
 0x10d   : > { %1751 = vmatprep.subr.bf16.mxu0 %v1750_v36  ;;  %v930_v36 = vld [vmem:[#allocation9 + $0xb0] sm:$0xff] }
 0x110   : > { %1753 = vmatpush1.bf16.msra.mxu0 %v1752_v40 }
 0x111   : > { %1755 = vmatprep.subr.bf16.mxu0 %v1754_v41  ;;  %v2528_v41 = vpack.c.bf16 %v930_v36, %v926_v35 }
 0x114   : > { %1757 = vmatpush1.bf16.msra.mxu0 %v1756_v46  ;;  %v934_v46 = vld [vmem:[#allocation9 + $0xd0] sm:$0xff] }
 0x115   : > { %1759 = vmatprep.subr.bf16.mxu0 %v1758_v47  ;;  %v938_v47 = vld [vmem:[#allocation9 + $0xf0] sm:$0xff] }
 0x118   : > { %1761 = vmatpush1.bf16.msra.mxu0 %v1760_v53  ;;  %v2536_v53 = vpack.c.bf16 %v938_v47, %v934_v46  ;;  %v979_v46 = vld [vmem:[#allocation9 + $0x238] sm:$0xff] }
 0x119   : > { %1763 = vmatprep.subr.bf16.mxu0 %v1762_v54 }
 0x11c   : > { %1765 = vmatpush1.bf16.msra.mxu0 %v1764_v61  ;;  %v946_v61 = vld [vmem:[#allocation9 + $0x130] sm:$0xff] }
 0x11d   : > { %1767 = vmatprep.subr.bf16.mxu0 %v1766_v62 }
 0x120   : > { %1769 = vmatpush1.bf16.msra.mxu0 %v1768_v5 }
 0x182   : > { %v512_v8 = vpop.f32.mrb[0].mxu0 }
 0x183   : > { %v513_v9 = vadd.f32 %v512_v8, %v2506_v6  ;;  %v514_v10 = vpop.f32.mrb[1].mxu0  ;;  %v2544_v8 = vpack.c.bf16 %v946_v61, %v942_v60  ;;  %v983_v61 = vld [vmem:[#allocation9 + $0x258] sm:$0xff] }
 0x184   : > { %v515_v13 = vadd.f32 %v514_v10, %v2509_v7 }
 0x185   : > { %v607_v19 = vmax.f32 %v513_v9, 0.0 }
 0x186   : > { %v518_v16 = vpop.f32.mrb[2].mxu0  ;;  %v608_v17 = vmax.f32 %v515_v13, 0.0  ;;  %v950_v13 = vld [vmem:[#allocation9 + $0x150] sm:$0xff] }
 0x187   : > { %v519_v20 = vadd.f32 %v518_v16, %v2506_v6  ;;  %v520_v21 = vpop.f32.mrb[3].mxu0  ;;  %v959_v16 = vld [vmem:[#allocation9 + $0x198] sm:$0xff] }
 0x188   : > { %v521_v25 = vadd.f32 %v520_v21, %v2509_v7  ;;  %779 = vmatprep.mubr.f32.mxu1 %v608_v17  ;;  %v963_v17 = vld [vmem:[#allocation9 + $0x1b8] sm:$0xff]  ;;  %v2552_v21 = vpack.c.bf16 %v954_v14, %v950_v13  ;;  %v982_v13 = vld [vmem:[#allocation9 + $0x250] sm:$0xff] }
 0x189   : > { %780 = vmatmul.mubr.f32.vlgmr.msra.gmra.mrb[0].mxu1 %v607_v19  ;;  %v609_v31 = vmax.f32 %v519_v20, 0.0  ;;  %v2556_v26 = vpack.c.bf16 %v963_v17, %v959_v16  ;;  %v986_v14 = vld [vmem:[#allocation9 + $0x270] sm:$0xff]  ;;  %v991_v16 = vld [vmem:[#allocation9 + $0x298] sm:$0xff] }
 0x18a   : > { %v610_v28 = vmax.f32 %v521_v25, 0.0  ;;  %v524_v29 = vpop.f32.mrb[4].mxu0  ;;  %1854 = vmatpush1.bf16.msra.mxu1 %v2513_v18  ;;  %v995_v17 = vld [vmem:[#allocation9 + $0x2b8] sm:$0xff] }
 0x18b   : > { %v525_v32 = vadd.f32 %v524_v29, %v2506_v6  ;;  %v526_v33 = vpop.f32.mrb[5].mxu0  ;;  %1839 = vmatprep.subr.bf16.mxu1 %v2516_v22 }
 0x18c   : > { %v527_v37 = vadd.f32 %v526_v33, %v2509_v7  ;;  %785 = vmatprep.mubr.f32.mxu1 %v610_v28  ;;  %v962_v28 = vld [vmem:[#allocation9 + $0x1b0] sm:$0xff] }
 0x18d   : > { %786 = vmatmul.mubr.f32.gmra.mrb[2].mxu1 %v609_v31  ;;  %v611_v42 = vmax.f32 %v525_v32, 0.0  ;;  %v967_v31 = vld [vmem:[#allocation9 + $0x1d8] sm:$0xff]  ;;  %v2560_v36 = vpack.c.bf16 %v962_v28, %v958_v27  ;;  %v2588_v28 = vpack.c.bf16 %v995_v17, %v991_v16 }
 0x18e   : > { %v612_v0 = vmax.f32 %v527_v37, 0.0  ;;  %v530_v40 = vpop.f32.mrb[6].mxu0  ;;  %1855 = vmatpush1.bf16.msra.mxu1 %v2520_v30  ;;  %v971_v32 = vld [vmem:[#allocation9 + $0x1f8] sm:$0xff] }
 0x18f   : > { %v531_v43 = vadd.f32 %v530_v40, %v2506_v6  ;;  %v532_v44 = vpop.f32.mrb[7].mxu0  ;;  %1840 = vmatprep.subr.bf16.mxu1 %v2524_v34  ;;  %v966_v40 = vld [vmem:[#allocation9 + $0x1d0] sm:$0xff] }
 0x190   : > { %v533_v48 = vadd.f32 %v532_v44, %v2509_v7  ;;  %791 = vmatprep.mubr.f32.mxu1 %v612_v0  ;;  %v2564_v0 = vpack.c.bf16 %v971_v32, %v967_v31  ;;  %v975_v44 = vld [vmem:[#allocation9 + $0x218] sm:$0xff] }
 0x191   : > { %792 = vmatmul.mubr.f32.gmra.mrb[4].mxu1 %v611_v42  ;;  %v613_v54 = vmax.f32 %v531_v43, 0.0  ;;  %v970_v42 = vld [vmem:[#allocation9 + $0x1f0] sm:$0xff] }
 0x192   : > { %v614_v51 = vmax.f32 %v533_v48, 0.0  ;;  %v536_v52 = vpop.f32.mrb[8].mxu0  ;;  %1856 = vmatpush1.bf16.msra.mxu1 %v2528_v41  ;;  %v2568_v49 = vpack.c.bf16 %v970_v42, %v966_v40 }
 0x193   : > { %v537_v55 = vadd.f32 %v536_v52, %v2506_v6  ;;  %v538_v57 = vpop.f32.mrb[9].mxu0  ;;  %1841 = vmatprep.subr.bf16.mxu1 %v2532_v45 }
 0x194   : > { %v539_v62 = vadd.f32 %v538_v57, %v2509_v7  ;;  %797 = vmatprep.mubr.f32.mxu1 %v614_v51  ;;  %v978_v57 = vld [vmem:[#allocation9 + $0x230] sm:$0xff] }
 0x195   : > { %798 = vmatmul.mubr.f32.gmra.mrb[6].mxu1 %v613_v54  ;;  %v615_v9 = vmax.f32 %v537_v55, 0.0  ;;  %v2572_v54 = vpack.c.bf16 %v979_v46, %v975_v44  ;;  %v974_v55 = vld [vmem:[#allocation9 + $0x210] sm:$0xff] }
 0x196   : > { %v616_v3 = vmax.f32 %v539_v62, 0.0  ;;  %v542_v5 = vpop.f32.mrb[10].mxu0  ;;  %1857 = vmatpush1.bf16.msra.mxu1 %v2536_v53  ;;  %v987_v62 = vld [vmem:[#allocation9 + $0x278] sm:$0xff] }
 0x197   : > { %v543_v10 = vadd.f32 %v542_v5, %v2506_v6  ;;  %v544_v11 = vpop.f32.mrb[11].mxu0  ;;  %1842 = vmatprep.subr.bf16.mxu1 %v2540_v59 }
 0x198   : > { %v545_v15 = vadd.f32 %v544_v11, %v2509_v7  ;;  %803 = vmatprep.mubr.f32.mxu1 %v616_v3  ;;  %v2576_v3 = vpack.c.bf16 %v978_v57, %v974_v55  ;;  %v2580_v11 = vpack.c.bf16 %v987_v62, %v983_v61 }
 0x199   : > { %804 = vmatmul.mubr.f32.gmra.mrb[8].mxu1 %v615_v9  ;;  %v617_v23 = vmax.f32 %v543_v10, 0.0 }
 0x19a   : > { %v618_v19 = vmax.f32 %v545_v15, 0.0  ;;  %v548_v20 = vpop.f32.mrb[12].mxu0  ;;  %1858 = vmatpush1.bf16.msra.mxu1 %v2544_v8 }
 0x19b   : > { %v549_v24 = vadd.f32 %v548_v20, %v2506_v6  ;;  %v550_v25 = vpop.f32.mrb[13].mxu0  ;;  %1843 = vmatprep.subr.bf16.mxu1 %v2548_v12 }
 0x19c   : > { %v551_v29 = vadd.f32 %v550_v25, %v2509_v7  ;;  %809 = vmatprep.mubr.f32.mxu1 %v618_v19 }
 0x19d   : > { %810 = vmatmul.mubr.f32.gmra.mrb[10].mxu1 %v617_v23  ;;  %v619_v37 = vmax.f32 %v549_v24, 0.0  ;;  %v2584_v23 = vpack.c.bf16 %v986_v14, %v982_v13 }
 0x19e   : > { %v620_v33 = vmax.f32 %v551_v29, 0.0  ;;  %v554_v35 = vpop.f32.mrb[14].mxu0  ;;  %1859 = vmatpush1.bf16.msra.mxu1 %v2552_v21 }
 0x19f   : > { %v555_v38 = vadd.f32 %v554_v35, %v2506_v6  ;;  %v556_v39 = vpop.f32.mrb[15].mxu0  ;;  %1844 = vmatprep.subr.bf16.mxu1 %v2556_v26 }
 0x1a0   : > { %v557_v43 = vadd.f32 %v556_v39, %v2509_v7  ;;  %815 = vmatprep.mubr.f32.mxu1 %v620_v33 }
 0x1a1   : > { %816 = vmatmul.mubr.f32.gmra.mrb[12].mxu1 %v619_v37  ;;  %v621_v50 = vmax.f32 %v555_v38, 0.0 }
 0x1a2   : > { %v622_v47 = vmax.f32 %v557_v43, 0.0  ;;  %v560_v48 = vpop.f32.mrb[16].mxu0  ;;  %1860 = vmatpush1.bf16.msra.mxu1 %v2560_v36 }
 0x1a3   : > { %v561_v51 = vadd.f32 %v560_v48, %v2506_v6  ;;  %v562_v52 = vpop.f32.mrb[17].mxu0  ;;  %1845 = vmatprep.subr.bf16.mxu1 %v2564_v0 }
 0x1a4   : > { %v563_v60 = vadd.f32 %v562_v52, %v2509_v7  ;;  %821 = vmatprep.mubr.f32.mxu1 %v622_v47 }
 0x1a5   : > { %822 = vmatmul.mubr.f32.gmra.mrb[14].mxu1 %v621_v50  ;;  %v623_v5 = vmax.f32 %v561_v51, 0.0 }
 0x1a6   : > { %v624_v63 = vmax.f32 %v563_v60, 0.0  ;;  %v566_v1 = vpop.f32.mrb[18].mxu0  ;;  %1861 = vmatpush1.bf16.msra.mxu1 %v2568_v49 }
 0x1a7   : > { %v567_v9 = vadd.f32 %v566_v1, %v2506_v6  ;;  %v568_v10 = vpop.f32.mrb[19].mxu0  ;;  %1846 = vmatprep.subr.bf16.mxu1 %v2572_v54 }
 0x1a8   : > { %v569_v15 = vadd.f32 %v568_v10, %v2509_v7  ;;  %827 = vmatprep.mubr.f32.mxu1 %v624_v63 }
 0x1a9   : > { %828 = vmatmul.mubr.f32.gmra.mrb[16].mxu1 %v623_v5  ;;  %v625_v24 = vmax.f32 %v567_v9, 0.0 }
 0x1aa   : > { %v626_v19 = vmax.f32 %v569_v15, 0.0  ;;  %v572_v20 = vpop.f32.mrb[20].mxu0  ;;  %1862 = vmatpush1.bf16.msra.mxu1 %v2576_v3 }
 0x1ab   : > { %v573_v25 = vadd.f32 %v572_v20, %v2506_v6  ;;  %v574_v27 = vpop.f32.mrb[21].mxu0  ;;  %1847 = vmatprep.subr.bf16.mxu1 %v2580_v11  ;;  %v994_v20 = vld [vmem:[#allocation9 + $0x2b0] sm:$0xff] }
 0x1ac   : > { %v575_v29 = vadd.f32 %v574_v27, %v2509_v7  ;;  %833 = vmatprep.mubr.f32.mxu1 %v626_v19  ;;  %v990_v19 = vld [vmem:[#allocation9 + $0x290] sm:$0xff]  ;;  %v1033_v27 = vld [vmem:[#allocation9 + $0x3e8] sm:$0xff] }
 0x1ad   : > { %834 = vmatmul.mubr.f32.gmra.mrb[18].mxu1 %v625_v24  ;;  %v627_v33 = vmax.f32 %v573_v25, 0.0  ;;  %v2603_v24 = vpack.c.bf16 %v994_v20, %v990_v19  ;;  %v1029_v25 = vld [vmem:[#allocation9 + $0x3c8] sm:$0xff] }
 0x1ae   : > { %v628_v31 = vmax.f32 %v575_v29, 0.0  ;;  %v578_v32 = vpop.f32.mrb[22].mxu0  ;;  %1863 = vmatpush1.bf16.msra.mxu1 %v2584_v23  ;;  %v999_v29 = vld [vmem:[#allocation9 + $0x2d8] sm:$0xff] }
 0x1af   : > { %v579_v35 = vadd.f32 %v578_v32, %v2506_v6  ;;  %v580_v37 = vpop.f32.mrb[23].mxu0  ;;  %1848 = vmatprep.subr.bf16.mxu1 %v2588_v28  ;;  %v1032_v32 = vld [vmem:[#allocation9 + $0x3e0] sm:$0xff] }
 0x1b0   : > { %v581_v38 = vadd.f32 %v580_v37, %v2509_v7  ;;  %839 = vmatprep.mubr.f32.mxu1 %v628_v31  ;;  %v1770_v31 = vpack.c.bf16 %v1033_v27, %v1029_v25  ;;  %v998_v37 = vld [vmem:[#allocation9 + $0x2d0] sm:$0xff] }
 0x1b1   : > { %840 = vmatmul.mubr.f32.gmra.mrb[20].mxu1 %v627_v33  ;;  %v629_v42 = vmax.f32 %v579_v35, 0.0  ;;  %v1003_v33 = vld [vmem:[#allocation9 + $0x2f8] sm:$0xff] }
 0x1b2   : > { %v630_v39 = vmax.f32 %v581_v38, 0.0  ;;  %v584_v40 = vpop.f32.mrb[24].mxu0  ;;  %1864 = vmatpush1.bf16.msra.mxu1 %v2603_v24  ;;  %v2606_v35 = vpack.c.bf16 %v1003_v33, %v999_v29  ;;  %v1002_v38 = vld [vmem:[#allocation9 + $0x2f0] sm:$0xff]  ;;  %1771 = vmatprep.subr.bf16.mxu0 %v1770_v31 }
 0x1b3   : > { %v585_v43 = vadd.f32 %v584_v40, %v2506_v6  ;;  %v586_v44 = vpop.f32.mrb[25].mxu0  ;;  %v1007_v40 = vld [vmem:[#allocation9 + $0x318] sm:$0xff] }
 0x1b4   : > { %v587_v46 = vadd.f32 %v586_v44, %v2509_v7  ;;  %845 = vmatprep.mubr.f32.mxu1 %v630_v39  ;;  %v2608_v39 = vpack.c.bf16 %v1002_v38, %v998_v37  ;;  %1849 = vmatprep.subr.bf16.mxu1 %v2606_v35  ;;  %v1006_v44 = vld [vmem:[#allocation9 + $0x310] sm:$0xff] }
 0x1b5   : > { %846 = vmatmul.mubr.f32.gmra.mrb[22].mxu1 %v629_v42  ;;  %v631_v50 = vmax.f32 %v585_v43, 0.0  ;;  %v1011_v42 = vld [vmem:[#allocation9 + $0x338] sm:$0xff] }
 0x1b6   : > { %v632_v47 = vmax.f32 %v587_v46, 0.0  ;;  %v590_v48 = vpop.f32.mrb[26].mxu0  ;;  %1865 = vmatpush1.bf16.msra.mxu1 %v2608_v39  ;;  %v2613_v43 = vpack.c.bf16 %v1011_v42, %v1007_v40  ;;  %v1010_v46 = vld [vmem:[#allocation9 + $0x330] sm:$0xff] }
 0x1b7   : > { %v591_v51 = vadd.f32 %v590_v48, %v2506_v6  ;;  %v592_v52 = vpop.f32.mrb[27].mxu0  ;;  %v1015_v48 = vld [vmem:[#allocation9 + $0x358] sm:$0xff] }
 0x1b8   : > { %v593_v55 = vadd.f32 %v592_v52, %v2509_v7  ;;  %851 = vmatprep.mubr.f32.mxu1 %v632_v47  ;;  %v2615_v47 = vpack.c.bf16 %v1010_v46, %v1006_v44  ;;  %1850 = vmatprep.subr.bf16.mxu1 %v2613_v43  ;;  %v1014_v52 = vld [vmem:[#allocation9 + $0x350] sm:$0xff] }
 0x1b9   : > { %852 = vmatmul.mubr.f32.gmra.mrb[24].mxu1 %v631_v50  ;;  %v633_v61 = vmax.f32 %v591_v51, 0.0  ;;  %v1019_v50 = vld [vmem:[#allocation9 + $0x378] sm:$0xff] }
 0x1ba   : > { %v634_v57 = vmax.f32 %v593_v55, 0.0  ;;  %v596_v60 = vpop.f32.mrb[28].mxu0  ;;  %1866 = vmatpush1.bf16.msra.mxu1 %v2615_v47  ;;  %v2619_v51 = vpack.c.bf16 %v1019_v50, %v1015_v48  ;;  %v1018_v55 = vld [vmem:[#allocation9 + $0x370] sm:$0xff] }
 0x1bb   : > { %v597_v62 = vadd.f32 %v596_v60, %v2506_v6  ;;  %v598_v63 = vpop.f32.mrb[29].mxu0  ;;  %v1027_v60 = vld [vmem:[#allocation9 + $0x3b8] sm:$0xff] }
 0x1bc   : > { %v599_v1 = vadd.f32 %v598_v63, %v2509_v7  ;;  %857 = vmatprep.mubr.f32.mxu1 %v634_v57  ;;  %v2621_v57 = vpack.c.bf16 %v1018_v55, %v1014_v52  ;;  %1851 = vmatprep.subr.bf16.mxu1 %v2619_v51  ;;  %v1026_v63 = vld [vmem:[#allocation9 + $0x3b0] sm:$0xff] }
 0x1bd   : > { %858 = vmatmul.mubr.f32.gmra.mrb[26].mxu1 %v633_v61  ;;  %v635_v10 = vmax.f32 %v597_v62, 0.0  ;;  %v1022_v62 = vld [vmem:[#allocation9 + $0x390] sm:$0xff] }
 0x1be   : > { %v636_v5 = vmax.f32 %v599_v1, 0.0  ;;  %v602_v9 = vpop.f32.mrb[30].mxu0  ;;  %1867 = vmatpush1.bf16.msra.mxu1 %v2621_v57  ;;  %v2627_v1 = vpack.c.bf16 %v1026_v63, %v1022_v62 }
 0x1bf   : > { %v603_v13 = vadd.f32 %v602_v9, %v2506_v6  ;;  %v604_v14 = vpop.f32.mrb[31].mxu0  ;;  %v1028_v6 = vld [vmem:[#allocation9 + $0x3c0] sm:$0xff]  ;;  %v1035_v9 = vld [vmem:[#allocation9 + $0x3f8] sm:$0xff] }
 0x1c0   : > { %v605_v15 = vadd.f32 %v604_v14, %v2509_v7  ;;  %863 = vmatprep.mubr.f32.mxu1 %v636_v5  ;;  %v1772_v7 = vpack.c.bf16 %v1032_v32, %v1028_v6  ;;  %v1031_v5 = vld [vmem:[#allocation9 + $0x3d8] sm:$0xff]  ;;  %v1034_v14 = vld [vmem:[#allocation9 + $0x3f0] sm:$0xff] }
 0x1c1   : > { %864 = vmatmul.mubr.f32.gmra.mrb[28].mxu1 %v635_v10  ;;  %v637_v17 = vmax.f32 %v603_v13, 0.0  ;;  %v2631_v10 = vpack.c.bf16 %v1035_v9, %v1031_v5  ;;  %v1030_v13 = vld [vmem:[#allocation9 + $0x3d0] sm:$0xff] }
 0x1c2   : > { %v638_v16 = vmax.f32 %v605_v15, 0.0  ;;  %1773 = vmatpush1.bf16.msra.mxu0 %v1772_v7  ;;  %v2633_v15 = vpack.c.bf16 %v1034_v14, %v1030_v13 }
 0x1c3   : > { %1775 = vmatprep.subr.bf16.mxu0 %v2491_v56  ;;  %v1023_v56 = vld [vmem:[#allocation9 + $0x398] sm:$0xff] }
 0x1c4   : > { %869 = vmatprep.mubr.f32.mxu1 %v638_v16  ;;  %v2625_v61 = vpack.c.bf16 %v1027_v60, %v1023_v56  ;;  %v703_v16 = vld [vmem:[%s2971_s4] sm:$0x3] }
 0x1c5   : > { %870 = vmatmul.mubr.f32.gmra.mrb[30].mxu1 %v637_v17  ;;  %v2641_v17 = vrot.slane %v703_v16, %v2497_v2  ;;  %v2644_v19 = vrot.slane %v703_v16, %v2503_v4 }
 0x1c6   : > { %1852 = vmatprep.subr.bf16.mxu1 %v2625_v61 }
 0x1c7   : > { %1868 = vmatpush1.bf16.msra.mxu1 %v2627_v1 }
 0x1c8   : > { %1853 = vmatprep.subr.bf16.mxu1 %v2631_v10 }
 0x1cb   : > { %1869 = vmatpush1.bf16.msra.mxu1 %v2633_v15 }
 0x25c   : > { %v781_v20 = vpop.f32.mrb[0].mxu1 }
 0x25d   : > { %v2647_v25 = vadd.f32 %v781_v20, %v2641_v17  ;;  %v783_v27 = vpop.f32.mrb[1].mxu1 }
 0x25e   : > { %v2650_v29 = vadd.f32 %v783_v27, %v2644_v19 }
 0x25f   : > { %v876_v32 = vmax.f32 %v2647_v25, 0.0 }
 0x260   : > { %v877_v31 = vmax.f32 %v2650_v29, 0.0  ;;  %v787_v6 = vpop.f32.mrb[2].mxu1 }
 0x261   : > { %v2655_v33 = vadd.f32 %v787_v6, %v2641_v17  ;;  %v789_v7 = vpop.f32.mrb[3].mxu1 }
 0x262   : > { %v2658_v37 = vadd.f32 %v789_v7, %v2644_v19  ;;  %1122 = vmatprep.mubr.f32.mxu0 %v877_v31 }
 0x263   : > { %1123 = vmatmul.mubr.f32.vlgmr.msra.gmra.mrb[32].mxu0 %v876_v32  ;;  %v878_v42 = vmax.f32 %v2655_v33, 0.0 }
 0x264   : > { %v879_v38 = vmax.f32 %v2658_v37, 0.0  ;;  %1777 = vmatpush1.bf16.msra.mxu0 %v2513_v18  ;;  %v793_v40 = vpop.f32.mrb[4].mxu1  ;;  %v1048_v37 = vsub.s32 2, %v2494_v58 }
 0x265   : > { %v2668_v44 = vadd.f32 %v793_v40, %v2641_v17  ;;  %v795_v46 = vpop.f32.mrb[5].mxu1  ;;  %1779 = vmatprep.subr.bf16.mxu0 %v2516_v22 }
 0x266   : > { %v2672_v48 = vadd.f32 %v795_v46, %v2644_v19  ;;  %1128 = vmatprep.mubr.f32.mxu0 %v879_v38 }
 0x267   : > { %1129 = vmatmul.mubr.f32.gmra.mrb[34].mxu0 %v878_v42  ;;  %v880_v52 = vmax.f32 %v2668_v44, 0.0 }
 0x268   : > { %v881_v18 = vmax.f32 %v2672_v48, 0.0  ;;  %1781 = vmatpush1.bf16.msra.mxu0 %v2520_v30  ;;  %v799_v50 = vpop.f32.mrb[6].mxu1 }
 0x269   : > { %v2682_v55 = vadd.f32 %v799_v50, %v2641_v17  ;;  %v801_v22 = vpop.f32.mrb[7].mxu1  ;;  %1783 = vmatprep.subr.bf16.mxu0 %v2524_v34 }
 0x26a   : > { %v2686_v56 = vadd.f32 %v801_v22, %v2644_v19  ;;  %1134 = vmatprep.mubr.f32.mxu0 %v881_v18 }
 0x26b   : > { %1135 = vmatmul.mubr.f32.gmra.mrb[36].mxu0 %v880_v52  ;;  %v882_v62 = vmax.f32 %v2682_v55, 0.0 }
 0x26c   : > { %v883_v30 = vmax.f32 %v2686_v56, 0.0  ;;  %1785 = vmatpush1.bf16.msra.mxu0 %v2528_v41  ;;  %v805_v60 = vpop.f32.mrb[8].mxu1 }
 0x26d   : > { %v806_v63 = vadd.f32 %v805_v60, %v2641_v17  ;;  %v807_v5 = vpop.f32.mrb[9].mxu1  ;;  %1787 = vmatprep.subr.bf16.mxu0 %v2532_v45 }
 0x26e   : > { %v808_v34 = vadd.f32 %v807_v5, %v2644_v19  ;;  %1140 = vmatprep.mubr.f32.mxu0 %v883_v30 }
 0x26f   : > { %1141 = vmatmul.mubr.f32.gmra.mrb[38].mxu0 %v882_v62  ;;  %v884_v13 = vmax.f32 %v806_v63, 0.0 }
 0x270   : > { %v885_v9 = vmax.f32 %v808_v34, 0.0  ;;  %1789 = vmatpush1.bf16.msra.mxu0 %v2536_v53  ;;  %v811_v41 = vpop.f32.mrb[10].mxu1 }
 0x271   : > { %v812_v14 = vadd.f32 %v811_v41, %v2641_v17  ;;  %v813_v16 = vpop.f32.mrb[11].mxu1  ;;  %1791 = vmatprep.subr.bf16.mxu0 %v2540_v59 }
 0x272   : > { %v814_v45 = vadd.f32 %v813_v16, %v2644_v19  ;;  %1146 = vmatprep.mubr.f32.mxu0 %v885_v9  ;;  %1307 = vmatprep.mubr.f32.mxu1 %v885_v9 }
 0x273   : > { %1147 = vmatmul.mubr.f32.gmra.mrb[40].mxu0 %v884_v13  ;;  %1308 = vmatmul.mubr.f32.vlgmr.msra.gmra.mrb[32].mxu1 %v884_v13  ;;  %v886_v6 = vmax.f32 %v812_v14, 0.0 }
 0x274   : > { %v887_v20 = vmax.f32 %v814_v45, 0.0  ;;  %1793 = vmatpush1.bf16.msra.mxu0 %v2544_v8  ;;  %v817_v27 = vpop.f32.mrb[12].mxu1 }
 0x275   : > { %v818_v53 = vadd.f32 %v817_v27, %v2641_v17  ;;  %v819_v7 = vpop.f32.mrb[13].mxu1  ;;  %1795 = vmatprep.subr.bf16.mxu0 %v2548_v12 }
 0x276   : > { %v820_v40 = vadd.f32 %v819_v7, %v2644_v19  ;;  %1152 = vmatprep.mubr.f32.mxu0 %v887_v20  ;;  %1313 = vmatprep.mubr.f32.mxu1 %v887_v20 }
 0x277   : > { %1153 = vmatmul.mubr.f32.gmra.mrb[42].mxu0 %v886_v6  ;;  %1314 = vmatmul.mubr.f32.gmra.mrb[34].mxu1 %v886_v6  ;;  %v888_v50 = vmax.f32 %v818_v53, 0.0 }
 0x278   : > { %v889_v59 = vmax.f32 %v820_v40, 0.0  ;;  %1797 = vmatpush1.bf16.msra.mxu0 %v2552_v21  ;;  %v823_v46 = vpop.f32.mrb[14].mxu1 }
 0x279   : > { %v824_v8 = vadd.f32 %v823_v46, %v2641_v17  ;;  %v825_v22 = vpop.f32.mrb[15].mxu1  ;;  %1799 = vmatprep.subr.bf16.mxu0 %v2556_v26 }
 0x27a   : > { %v826_v60 = vadd.f32 %v825_v22, %v2644_v19  ;;  %1158 = vmatprep.mubr.f32.mxu0 %v889_v59  ;;  %1319 = vmatprep.mubr.f32.mxu1 %v889_v59 }
 0x27b   : > { %1159 = vmatmul.mubr.f32.gmra.mrb[44].mxu0 %v888_v50  ;;  %1320 = vmatmul.mubr.f32.gmra.mrb[36].mxu1 %v888_v50  ;;  %v890_v5 = vmax.f32 %v824_v8, 0.0 }
 0x27c   : > { %v891_v12 = vmax.f32 %v826_v60, 0.0  ;;  %1801 = vmatpush1.bf16.msra.mxu0 %v2560_v36  ;;  %v829_v63 = vpop.f32.mrb[16].mxu1 }
 0x27d   : > { %v830_v21 = vadd.f32 %v829_v63, %v2641_v17  ;;  %v831_v34 = vpop.f32.mrb[17].mxu1  ;;  %1803 = vmatprep.subr.bf16.mxu0 %v2564_v0 }
 0x27e   : > { %v832_v9 = vadd.f32 %v831_v34, %v2644_v19  ;;  %1164 = vmatprep.mubr.f32.mxu0 %v891_v12  ;;  %1325 = vmatprep.mubr.f32.mxu1 %v891_v12 }
 0x27f   : > { %1165 = vmatmul.mubr.f32.gmra.mrb[46].mxu0 %v890_v5  ;;  %1326 = vmatmul.mubr.f32.gmra.mrb[38].mxu1 %v890_v5  ;;  %v892_v13 = vmax.f32 %v830_v21, 0.0 }
 0x280   : > { %v893_v26 = vmax.f32 %v832_v9, 0.0  ;;  %1805 = vmatpush1.bf16.msra.mxu0 %v2568_v49  ;;  %v835_v41 = vpop.f32.mrb[18].mxu1 }
 0x281   : > { %v836_v36 = vadd.f32 %v835_v41, %v2641_v17  ;;  %v837_v14 = vpop.f32.mrb[19].mxu1  ;;  %1807 = vmatprep.subr.bf16.mxu0 %v2572_v54 }
 0x282   : > { %v838_v16 = vadd.f32 %v837_v14, %v2644_v19  ;;  %1170 = vmatprep.mubr.f32.mxu0 %v893_v26  ;;  %1331 = vmatprep.mubr.f32.mxu1 %v893_v26 }
 0x283   : > { %1171 = vmatmul.mubr.f32.gmra.mrb[48].mxu0 %v892_v13  ;;  %1332 = vmatmul.mubr.f32.gmra.mrb[40].mxu1 %v892_v13  ;;  %v894_v20 = vmax.f32 %v836_v36, 0.0 }
 0x284   : > { %v895_v0 = vmax.f32 %v838_v16, 0.0  ;;  %1809 = vmatpush1.bf16.msra.mxu0 %v2576_v3  ;;  %v841_v45 = vpop.f32.mrb[20].mxu1 }
 0x285   : > { %v842_v49 = vadd.f32 %v841_v45, %v2641_v17  ;;  %v843_v27 = vpop.f32.mrb[21].mxu1  ;;  %1811 = vmatprep.subr.bf16.mxu0 %v2580_v11 }
 0x286   : > { %v844_v6 = vadd.f32 %v843_v27, %v2644_v19  ;;  %1176 = vmatprep.mubr.f32.mxu0 %v895_v0  ;;  %1337 = vmatprep.mubr.f32.mxu1 %v895_v0 }
 0x287   : > { %1177 = vmatmul.mubr.f32.gmra.mrb[50].mxu0 %v894_v20  ;;  %1338 = vmatmul.mubr.f32.gmra.mrb[42].mxu1 %v894_v20  ;;  %v896_v7 = vmax.f32 %v842_v49, 0.0 }
 0x288   : > { %v897_v54 = vmax.f32 %v844_v6, 0.0  ;;  %1813 = vmatpush1.bf16.msra.mxu0 %v2584_v23  ;;  %v847_v53 = vpop.f32.mrb[22].mxu1 }
 0x289   : > { %v848_v3 = vadd.f32 %v847_v53, %v2641_v17  ;;  %v849_v40 = vpop.f32.mrb[23].mxu1  ;;  %1815 = vmatprep.subr.bf16.mxu0 %v2588_v28 }
 0x28a   : > { %v850_v59 = vadd.f32 %v849_v40, %v2644_v19  ;;  %1182 = vmatprep.mubr.f32.mxu0 %v897_v54  ;;  %1343 = vmatprep.mubr.f32.mxu1 %v897_v54 }
 0x28b   : > { %1183 = vmatmul.mubr.f32.gmra.mrb[52].mxu0 %v896_v7  ;;  %1344 = vmatmul.mubr.f32.gmra.mrb[44].mxu1 %v896_v7  ;;  %v898_v50 = vmax.f32 %v848_v3, 0.0 }
 0x28c   : > { %v899_v11 = vmax.f32 %v850_v59, 0.0  ;;  %1817 = vmatpush1.bf16.msra.mxu0 %v2603_v24  ;;  %v853_v46 = vpop.f32.mrb[24].mxu1 }
 0x28d   : > { %v854_v23 = vadd.f32 %v853_v46, %v2641_v17  ;;  %v855_v8 = vpop.f32.mrb[25].mxu1  ;;  %1819 = vmatprep.subr.bf16.mxu0 %v2606_v35 }
 0x28e   : > { %v856_v22 = vadd.f32 %v855_v8, %v2644_v19  ;;  %1188 = vmatprep.mubr.f32.mxu0 %v899_v11  ;;  %1349 = vmatprep.mubr.f32.mxu1 %v899_v11 }
 0x28f   : > { %1189 = vmatmul.mubr.f32.gmra.mrb[54].mxu0 %v898_v50  ;;  %1350 = vmatmul.mubr.f32.gmra.mrb[46].mxu1 %v898_v50  ;;  %v900_v12 = vmax.f32 %v854_v23, 0.0 }
 0x290   : > { %v901_v28 = vmax.f32 %v856_v22, 0.0  ;;  %1821 = vmatpush1.bf16.msra.mxu0 %v2608_v39  ;;  %v859_v60 = vpop.f32.mrb[26].mxu1 }
 0x291   : > { %v860_v24 = vadd.f32 %v859_v60, %v2641_v17  ;;  %v861_v63 = vpop.f32.mrb[27].mxu1  ;;  %1823 = vmatprep.subr.bf16.mxu0 %v2613_v43 }
 0x292   : > { %v862_v5 = vadd.f32 %v861_v63, %v2644_v19  ;;  %1194 = vmatprep.mubr.f32.mxu0 %v901_v28  ;;  %1355 = vmatprep.mubr.f32.mxu1 %v901_v28 }
 0x293   : > { %1195 = vmatmul.mubr.f32.gmra.mrb[56].mxu0 %v900_v12  ;;  %1356 = vmatmul.mubr.f32.gmra.mrb[48].mxu1 %v900_v12  ;;  %v902_v34 = vmax.f32 %v860_v24, 0.0 }
 0x294   : > { %v903_v35 = vmax.f32 %v862_v5, 0.0  ;;  %1825 = vmatpush1.bf16.msra.mxu0 %v2615_v47  ;;  %v865_v21 = vpop.f32.mrb[28].mxu1 }
 0x295   : > { %v866_v39 = vadd.f32 %v865_v21, %v2641_v17  ;;  %v867_v9 = vpop.f32.mrb[29].mxu1  ;;  %1827 = vmatprep.subr.bf16.mxu0 %v2619_v51 }
 0x296   : > { %v868_v26 = vadd.f32 %v867_v9, %v2644_v19  ;;  %1200 = vmatprep.mubr.f32.mxu0 %v903_v35  ;;  %1361 = vmatprep.mubr.f32.mxu1 %v903_v35 }
 0x297   : > { %1201 = vmatmul.mubr.f32.gmra.mrb[58].mxu0 %v902_v34  ;;  %1362 = vmatmul.mubr.f32.gmra.mrb[50].mxu1 %v902_v34  ;;  %v904_v13 = vmax.f32 %v866_v39, 0.0 }
 0x298   : > { %v905_v43 = vmax.f32 %v868_v26, 0.0  ;;  %1829 = vmatpush1.bf16.msra.mxu0 %v2621_v57  ;;  %v871_v41 = vpop.f32.mrb[30].mxu1  ;;  %v1036_v57 = vld [vmem:[%s2973_s6] sm:$0xf] }
 0x299   : > { %v872_v47 = vadd.f32 %v871_v41, %v2641_v17  ;;  %v873_v36 = vpop.f32.mrb[31].mxu1  ;;  %1831 = vmatprep.subr.bf16.mxu0 %v2625_v61  ;;  %v2770_v61 = vrot.slane %v1036_v57, %v2497_v2 }
 0x29a   : > { %v874_v14 = vadd.f32 %v873_v36, %v2644_v19  ;;  %1206 = vmatprep.mubr.f32.mxu0 %v905_v43  ;;  %1367 = vmatprep.mubr.f32.mxu1 %v905_v43 }
 0x29b   : > { %1207 = vmatmul.mubr.f32.gmra.mrb[60].mxu0 %v904_v13  ;;  %1368 = vmatmul.mubr.f32.gmra.mrb[52].mxu1 %v904_v13  ;;  %v906_v16 = vmax.f32 %v872_v47, 0.0 }
 0x29c   : > { %v907_v51 = vmax.f32 %v874_v14, 0.0  ;;  %1833 = vmatpush1.bf16.msra.mxu0 %v2627_v1  ;;  %v2773_v1 = vrot.slane %v1036_v57, %v2503_v4 }
 0x29d   : > { %1835 = vmatprep.subr.bf16.mxu0 %v2631_v10 }
 0x29e   : > { %1212 = vmatprep.mubr.f32.mxu0 %v907_v51  ;;  %1373 = vmatprep.mubr.f32.mxu1 %v907_v51 }
 0x29f   : > { %1213 = vmatmul.mubr.f32.gmra.mrb[62].mxu0 %v906_v16  ;;  %1374 = vmatmul.mubr.f32.gmra.mrb[54].mxu1 %v906_v16 }
 0x2a0   : > { %1837 = vmatpush1.bf16.msra.mxu0 %v2633_v15  ;;  %1283 = vmatprep.mubr.f32.mxu0 %v877_v31 }
 0x2a3   : > { %1284 = vmatmul.mubr.f32.vlgmr.msra.gmra.mrb[64].mxu0 %v876_v32 }
 0x2a4   : > { %1289 = vmatprep.mubr.f32.mxu0 %v879_v38 }
 0x2a7   : > { %1290 = vmatmul.mubr.f32.gmra.mrb[66].mxu0 %v878_v42  ;;  %v1052_v42 = vsub.s32 3, %v2494_v58 }
 0x2a8   : > { %1295 = vmatprep.mubr.f32.mxu0 %v881_v18 }
 0x2a9   : > { %v2795_v56 = vrot.slane %v1036_v57, %v1052_v42 }
 0x2ab   : > { %1296 = vmatmul.mubr.f32.gmra.mrb[68].mxu0 %v880_v52  ;;  %v2792_v52 = vrot.slane %v1036_v57, %v1048_v37 }
 0x2ac   : > { %1301 = vmatprep.mubr.f32.mxu0 %v883_v30 }
 0x2af   : > { %1302 = vmatmul.mubr.f32.gmra.mrb[70].mxu0 %v882_v62 }
 0x336   : > { %v1124_v10 = vpop.f32.mrb[32].mxu0 }
 0x337   : > { %v1125_v15 = vadd.f32 %v1124_v10, %v2770_v61  ;;  %v1126_v17 = vpop.f32.mrb[33].mxu0 }
 0x338   : > { %v1127_v19 = vadd.f32 %v1126_v17, %v2773_v1 }
 0x339   : > { %1380 = vst [vmem:[%s2777_s16] sm:$0xff] %v1125_v15 }
 0x33a   : > { %1381 = vst [vmem:[%s2777_s16 + $0x8] sm:$0xff] %v1127_v19  ;;  %v1130_v2 = vpop.f32.mrb[34].mxu0 }
 0x33b   : > { %v1131_v4 = vadd.f32 %v1130_v2, %v2770_v61  ;;  %v1132_v25 = vpop.f32.mrb[35].mxu0 }
 0x33c   : > { %v1133_v29 = vadd.f32 %v1132_v25, %v2773_v1 }
 0x33d   : > { %1384 = vst [vmem:[%s2777_s16 + $0x20] sm:$0xff] %v1131_v4 }
 0x33e   : > { %1385 = vst [vmem:[%s2777_s16 + $0x28] sm:$0xff] %v1133_v29  ;;  %v1136_v31 = vpop.f32.mrb[36].mxu0 }
 0x33f   : > { %v1137_v32 = vadd.f32 %v1136_v31, %v2770_v61  ;;  %v1138_v33 = vpop.f32.mrb[37].mxu0 }
 0x340   : > { %v1139_v38 = vadd.f32 %v1138_v33, %v2773_v1 }
 0x341   : > { %1388 = vst [vmem:[%s2777_s16 + $0x40] sm:$0xff] %v1137_v32 }
 0x342   : > { %1389 = vst [vmem:[%s2777_s16 + $0x48] sm:$0xff] %v1139_v38  ;;  %v1142_v44 = vpop.f32.mrb[38].mxu0 }
 0x343   : > { %v1143_v48 = vadd.f32 %v1142_v44, %v2770_v61  ;;  %v1144_v18 = vpop.f32.mrb[39].mxu0 }
 0x344   : > { %v1145_v55 = vadd.f32 %v1144_v18, %v2773_v1 }
 0x345   : > { %1392 = vst [vmem:[%s2777_s16 + $0x60] sm:$0xff] %v1143_v48 }
 0x346   : > { %1393 = vst [vmem:[%s2777_s16 + $0x68] sm:$0xff] %v1145_v55  ;;  %v1148_v30 = vpop.f32.mrb[40].mxu0  ;;  %v1309_v58 = vpop.f32.mrb[32].mxu1 }
 0x347   : > { %v1149_v62 = vadd.f32 %v1148_v30, %v2770_v61  ;;  %v1310_v0 = vadd.f32 %v1309_v58, %v2792_v52  ;;  %v1150_v45 = vpop.f32.mrb[41].mxu0  ;;  %v1311_v20 = vpop.f32.mrb[33].mxu1 }
 0x348   : > { %v1151_v49 = vadd.f32 %v1150_v45, %v2773_v1  ;;  %v1312_v27 = vadd.f32 %v1311_v20, %v2795_v56 }
 0x349   : > { %1396 = vst [vmem:[%s2777_s16 + $0x80] sm:$0xff] %v1149_v62  ;;  %1398 = vst [vmem:[%s2777_s16 + $0x90] sm:$0xff] %v1310_v0 }
 0x34a   : > { %1397 = vst [vmem:[%s2777_s16 + $0x88] sm:$0xff] %v1151_v49  ;;  %1399 = vst [vmem:[%s2777_s16 + $0x98] sm:$0xff] %v1312_v27  ;;  %v1154_v6 = vpop.f32.mrb[42].mxu0  ;;  %v1315_v54 = vpop.f32.mrb[34].mxu1 }
 0x34b   : > { %v1155_v53 = vadd.f32 %v1154_v6, %v2770_v61  ;;  %v1316_v7 = vadd.f32 %v1315_v54, %v2792_v52  ;;  %v1156_v3 = vpop.f32.mrb[43].mxu0  ;;  %v1317_v40 = vpop.f32.mrb[35].mxu1 }
 0x34c   : > { %v1157_v59 = vadd.f32 %v1156_v3, %v2773_v1  ;;  %v1318_v11 = vadd.f32 %v1317_v40, %v2795_v56 }
 0x34d   : > { %1400 = vst [vmem:[%s2777_s16 + $0xa0] sm:$0xff] %v1155_v53  ;;  %1402 = vst [vmem:[%s2777_s16 + $0xb0] sm:$0xff] %v1316_v7 }
 0x34e   : > { %1401 = vst [vmem:[%s2777_s16 + $0xa8] sm:$0xff] %v1157_v59  ;;  %1403 = vst [vmem:[%s2777_s16 + $0xb8] sm:$0xff] %v1318_v11  ;;  %v1160_v46 = vpop.f32.mrb[44].mxu0  ;;  %v1321_v50 = vpop.f32.mrb[36].mxu1 }
 0x34f   : > { %v1161_v23 = vadd.f32 %v1160_v46, %v2770_v61  ;;  %v1322_v8 = vadd.f32 %v1321_v50, %v2792_v52  ;;  %v1162_v22 = vpop.f32.mrb[45].mxu0  ;;  %v1323_v28 = vpop.f32.mrb[37].mxu1 }
 0x350   : > { %v1163_v60 = vadd.f32 %v1162_v22, %v2773_v1  ;;  %v1324_v12 = vadd.f32 %v1323_v28, %v2795_v56 }
 0x351   : > { %1404 = vst [vmem:[%s2777_s16 + $0xc0] sm:$0xff] %v1161_v23  ;;  %1406 = vst [vmem:[%s2777_s16 + $0xd0] sm:$0xff] %v1322_v8 }
 0x352   : > { %1405 = vst [vmem:[%s2777_s16 + $0xc8] sm:$0xff] %v1163_v60  ;;  %1407 = vst [vmem:[%s2777_s16 + $0xd8] sm:$0xff] %v1324_v12  ;;  %v1166_v24 = vpop.f32.mrb[46].mxu0  ;;  %v1327_v63 = vpop.f32.mrb[38].mxu1 }
 0x353   : > { %v1167_v5 = vadd.f32 %v1166_v24, %v2770_v61  ;;  %v1328_v35 = vadd.f32 %v1327_v63, %v2792_v52  ;;  %v1168_v21 = vpop.f32.mrb[47].mxu0  ;;  %v1329_v34 = vpop.f32.mrb[39].mxu1 }
 0x354   : > { %v1169_v39 = vadd.f32 %v1168_v21, %v2773_v1  ;;  %v1330_v9 = vadd.f32 %v1329_v34, %v2795_v56 }
 0x355   : > { %1408 = vst [vmem:[%s2777_s16 + $0xe0] sm:$0xff] %v1167_v5  ;;  %1410 = vst [vmem:[%s2777_s16 + $0xf0] sm:$0xff] %v1328_v35 }
 0x356   : > { %1409 = vst [vmem:[%s2777_s16 + $0xe8] sm:$0xff] %v1169_v39  ;;  %1411 = vst [vmem:[%s2777_s16 + $0xf8] sm:$0xff] %v1330_v9  ;;  %v1172_v26 = vpop.f32.mrb[48].mxu0  ;;  %v1333_v43 = vpop.f32.mrb[40].mxu1 }
 0x357   : > { %v1173_v41 = vadd.f32 %v1172_v26, %v2770_v61  ;;  %v1334_v13 = vadd.f32 %v1333_v43, %v2792_v52  ;;  %v1174_v47 = vpop.f32.mrb[49].mxu0  ;;  %v1335_v36 = vpop.f32.mrb[41].mxu1 }
 0x358   : > { %v1175_v14 = vadd.f32 %v1174_v47, %v2773_v1  ;;  %v1336_v51 = vadd.f32 %v1335_v36, %v2795_v56 }
 0x359   : > { %1412 = vst [vmem:[%s2777_s16 + $0x100] sm:$0xff] %v1173_v41  ;;  %1414 = vst [vmem:[%s2777_s16 + $0x110] sm:$0xff] %v1334_v13 }
 0x35a   : > { %1413 = vst [vmem:[%s2777_s16 + $0x108] sm:$0xff] %v1175_v14  ;;  %1415 = vst [vmem:[%s2777_s16 + $0x118] sm:$0xff] %v1336_v51  ;;  %v1178_v16 = vpop.f32.mrb[50].mxu0  ;;  %v1339_v57 = vpop.f32.mrb[42].mxu1 }
 0x35b   : > { %v1179_v10 = vadd.f32 %v1178_v16, %v2770_v61  ;;  %v1340_v15 = vadd.f32 %v1339_v57, %v2792_v52  ;;  %v1180_v17 = vpop.f32.mrb[51].mxu0  ;;  %v1341_v19 = vpop.f32.mrb[43].mxu1 }
 0x35c   : > { %v1181_v2 = vadd.f32 %v1180_v17, %v2773_v1  ;;  %v1342_v4 = vadd.f32 %v1341_v19, %v2795_v56 }
 0x35d   : > { %1416 = vst [vmem:[%s2777_s16 + $0x120] sm:$0xff] %v1179_v10  ;;  %1418 = vst [vmem:[%s2777_s16 + $0x130] sm:$0xff] %v1340_v15 }
 0x35e   : > { %1417 = vst [vmem:[%s2777_s16 + $0x128] sm:$0xff] %v1181_v2  ;;  %1419 = vst [vmem:[%s2777_s16 + $0x138] sm:$0xff] %v1342_v4  ;;  %v1184_v25 = vpop.f32.mrb[52].mxu0  ;;  %v1345_v29 = vpop.f32.mrb[44].mxu1 }
 0x35f   : > { %v1185_v31 = vadd.f32 %v1184_v25, %v2770_v61  ;;  %v1346_v32 = vadd.f32 %v1345_v29, %v2792_v52  ;;  %v1186_v33 = vpop.f32.mrb[53].mxu0  ;;  %v1347_v37 = vpop.f32.mrb[45].mxu1 }
 0x360   : > { %v1187_v38 = vadd.f32 %v1186_v33, %v2773_v1  ;;  %v1348_v42 = vadd.f32 %v1347_v37, %v2795_v56 }
 0x361   : > { %1420 = vst [vmem:[%s2777_s16 + $0x140] sm:$0xff] %v1185_v31  ;;  %1422 = vst [vmem:[%s2777_s16 + $0x150] sm:$0xff] %v1346_v32 }
 0x362   : > { %1421 = vst [vmem:[%s2777_s16 + $0x148] sm:$0xff] %v1187_v38  ;;  %1423 = vst [vmem:[%s2777_s16 + $0x158] sm:$0xff] %v1348_v42  ;;  %v1190_v44 = vpop.f32.mrb[54].mxu0  ;;  %v1351_v48 = vpop.f32.mrb[46].mxu1 }
 0x363   : > { %v1191_v18 = vadd.f32 %v1190_v44, %v2770_v61  ;;  %v1352_v55 = vadd.f32 %v1351_v48, %v2792_v52  ;;  %v1192_v30 = vpop.f32.mrb[55].mxu0  ;;  %v1353_v58 = vpop.f32.mrb[47].mxu1 }
 0x364   : > { %v1193_v62 = vadd.f32 %v1192_v30, %v2773_v1  ;;  %v1354_v0 = vadd.f32 %v1353_v58, %v2795_v56 }
 0x365   : > { %1424 = vst [vmem:[%s2777_s16 + $0x160] sm:$0xff] %v1191_v18  ;;  %1426 = vst [vmem:[%s2777_s16 + $0x170] sm:$0xff] %v1352_v55 }
 0x366   : > { %1425 = vst [vmem:[%s2777_s16 + $0x168] sm:$0xff] %v1193_v62  ;;  %1427 = vst [vmem:[%s2777_s16 + $0x178] sm:$0xff] %v1354_v0  ;;  %v1196_v45 = vpop.f32.mrb[56].mxu0  ;;  %v1357_v20 = vpop.f32.mrb[48].mxu1 }
 0x367   : > { %v1197_v49 = vadd.f32 %v1196_v45, %v2770_v61  ;;  %v1358_v27 = vadd.f32 %v1357_v20, %v2792_v52  ;;  %v1198_v6 = vpop.f32.mrb[57].mxu0  ;;  %v1359_v54 = vpop.f32.mrb[49].mxu1 }
 0x368   : > { %v1199_v53 = vadd.f32 %v1198_v6, %v2773_v1  ;;  %v1360_v7 = vadd.f32 %v1359_v54, %v2795_v56 }
 0x369   : > { %1428 = vst [vmem:[%s2777_s16 + $0x180] sm:$0xff] %v1197_v49  ;;  %1430 = vst [vmem:[%s2777_s16 + $0x190] sm:$0xff] %v1358_v27 }
 0x36a   : > { %1429 = vst [vmem:[%s2777_s16 + $0x188] sm:$0xff] %v1199_v53  ;;  %1431 = vst [vmem:[%s2777_s16 + $0x198] sm:$0xff] %v1360_v7  ;;  %v1202_v3 = vpop.f32.mrb[58].mxu0  ;;  %v1363_v40 = vpop.f32.mrb[50].mxu1 }
 0x36b   : > { %v1203_v59 = vadd.f32 %v1202_v3, %v2770_v61  ;;  %v1364_v11 = vadd.f32 %v1363_v40, %v2792_v52  ;;  %v1204_v46 = vpop.f32.mrb[59].mxu0  ;;  %v1365_v50 = vpop.f32.mrb[51].mxu1 }
 0x36c   : > { %v1205_v23 = vadd.f32 %v1204_v46, %v2773_v1  ;;  %v1366_v8 = vadd.f32 %v1365_v50, %v2795_v56 }
 0x36d   : > { %1432 = vst [vmem:[%s2777_s16 + $0x1a0] sm:$0xff] %v1203_v59  ;;  %1434 = vst [vmem:[%s2777_s16 + $0x1b0] sm:$0xff] %v1364_v11 }
 0x36e   : > { %1433 = vst [vmem:[%s2777_s16 + $0x1a8] sm:$0xff] %v1205_v23  ;;  %1435 = vst [vmem:[%s2777_s16 + $0x1b8] sm:$0xff] %v1366_v8  ;;  %v1208_v22 = vpop.f32.mrb[60].mxu0  ;;  %v1369_v28 = vpop.f32.mrb[52].mxu1 }
 0x36f   : > { %v1209_v60 = vadd.f32 %v1208_v22, %v2770_v61  ;;  %v1370_v12 = vadd.f32 %v1369_v28, %v2792_v52  ;;  %v1210_v24 = vpop.f32.mrb[61].mxu0  ;;  %v1371_v63 = vpop.f32.mrb[53].mxu1 }
 0x370   : > { %v1211_v5 = vadd.f32 %v1210_v24, %v2773_v1  ;;  %v1372_v35 = vadd.f32 %v1371_v63, %v2795_v56 }
 0x371   : > { %1436 = vst [vmem:[%s2777_s16 + $0x1c0] sm:$0xff] %v1209_v60  ;;  %1438 = vst [vmem:[%s2777_s16 + $0x1d0] sm:$0xff] %v1370_v12 }
 0x372   : > { %1437 = vst [vmem:[%s2777_s16 + $0x1c8] sm:$0xff] %v1211_v5  ;;  %1439 = vst [vmem:[%s2777_s16 + $0x1d8] sm:$0xff] %v1372_v35  ;;  %v1214_v21 = vpop.f32.mrb[62].mxu0  ;;  %v1375_v34 = vpop.f32.mrb[54].mxu1 }
 0x373   : > { %v1215_v39 = vadd.f32 %v1214_v21, %v2770_v61  ;;  %v1376_v9 = vadd.f32 %v1375_v34, %v2792_v52  ;;  %v1216_v26 = vpop.f32.mrb[63].mxu0  ;;  %v1377_v43 = vpop.f32.mrb[55].mxu1 }
 0x374   : > { %v1217_v41 = vadd.f32 %v1216_v26, %v2773_v1  ;;  %v1378_v13 = vadd.f32 %v1377_v43, %v2795_v56 }
 0x375   : > { %1440 = vst [vmem:[%s2777_s16 + $0x1e0] sm:$0xff] %v1215_v39  ;;  %1442 = vst [vmem:[%s2777_s16 + $0x1f0] sm:$0xff] %v1376_v9 }
 0x376   : > { %1441 = vst [vmem:[%s2777_s16 + $0x1e8] sm:$0xff] %v1217_v41  ;;  %1443 = vst [vmem:[%s2777_s16 + $0x1f8] sm:$0xff] %v1378_v13  ;;  %v1285_v47 = vpop.f32.mrb[64].mxu0 }
 0x377   : > { %v1286_v36 = vadd.f32 %v1285_v47, %v2792_v52  ;;  %v1287_v61 = vpop.f32.mrb[65].mxu0 }
 0x378   : > { %v1288_v14 = vadd.f32 %v1287_v61, %v2795_v56 }
 0x379   : > { %1382 = vst [vmem:[%s2777_s16 + $0x10] sm:$0xff] %v1286_v36 }
 0x37a   : > { %1383 = vst [vmem:[%s2777_s16 + $0x18] sm:$0xff] %v1288_v14  ;;  %v1291_v1 = vpop.f32.mrb[66].mxu0 }
 0x37b   : > { %v1292_v51 = vadd.f32 %v1291_v1, %v2792_v52  ;;  %v1293_v16 = vpop.f32.mrb[67].mxu0 }
 0x37c   : > { %v1294_v57 = vadd.f32 %v1293_v16, %v2795_v56 }
 0x37d   : > { %1386 = vst [vmem:[%s2777_s16 + $0x30] sm:$0xff] %v1292_v51 }
 0x37e   : > { %1387 = vst [vmem:[%s2777_s16 + $0x38] sm:$0xff] %v1294_v57  ;;  %v1297_v10 = vpop.f32.mrb[68].mxu0 }
 0x37f   : > { %v1298_v15 = vadd.f32 %v1297_v10, %v2792_v52  ;;  %v1299_v17 = vpop.f32.mrb[69].mxu0 }
 0x380   : > { %v1300_v19 = vadd.f32 %v1299_v17, %v2795_v56 }
 0x381   : > { %1390 = vst [vmem:[%s2777_s16 + $0x50] sm:$0xff] %v1298_v15 }
 0x382   : > { %1391 = vst [vmem:[%s2777_s16 + $0x58] sm:$0xff] %v1300_v19  ;;  %v1303_v2 = vpop.f32.mrb[70].mxu0 }
 0x383   : > { %v1304_v4 = vadd.f32 %v1303_v2, %v2792_v52  ;;  %v1305_v25 = vpop.f32.mrb[71].mxu0 }
 0x384   : > { %v1306_v29 = vadd.f32 %v1305_v25, %v2795_v56 }
 0x385   : > { %1394 = vst [vmem:[%s2777_s16 + $0x70] sm:$0xff] %v1304_v4 }
 0x386   : > { %1395 = vst [vmem:[%s2777_s16 + $0x78] sm:$0xff] %v1306_v29 }
 0x387   : > { %2099 = shalt.err (!%p2096_p0)
}
 0x388   : > { %s2100_s15 = scalar_lea.hbm %s2913_s20, 8192  ;;  %s2104_s16 = scalar_lea.hbm %s3000_s12, 16384 }
 0x389   : > { %p2101_p4 = scmp.ne.s32.totalorder %s2913_s20, %s2100_s15  ;;  %p2105_p12 = scmp.lt.u32.totalorder %s2913_s20, %s3000_s12 }
 0x38a   : > { %p2106_p1 = scmp.lt.u32.totalorder %s2104_s16, %s2100_s15  ;;  %p2108_p13 = scmp.lt.u32.totalorder %s2100_s15, %s2913_s20 }
 0x38b   : > { %p2102_p2 = pnand %p2101_p4, %p2383_p10 }
 0x38c   : > { %p2107_p11 = por %p2106_p1, %p2105_p12 }
 0x38d   : > { %p2103_p8 = pneg %p2102_p2 }
 0x38e   : > { %p2109_p6 = por %p2108_p13, %p2107_p11 }
 0x390   : > { %p2110_p3 = pnand %p2109_p6, %p2103_p8 }
 0x392   : > { %2113 = shalt.err (!%p2110_p3)
}
 0x393   : > { %s2190_s22 = smov 512   ;;  %s2191_s23 = smov 32  }
 0x394   : > { %1884 = dma.vmem_to_hbm [thread:$0]  (%p2383_p10), %s2915_s21, 8192, %s2913_s20, %s1445_s30, %s2190_s22, %s2190_s22, %s2191_s23  }
 0x395 PF: > { %s3001_s9 = sld [smem:[#allocation16_spill]]  ;;  %s3002_s11 = sld [smem:[#allocation18_spill]] }
 0x396   : > { %p3004_p7 = scmp.ge.s32.totalorder %s2176_s29, 2 }
 0x39b   : > { %s1476_s13 = sand.u32 1, %s3001_s9   ;;  %p3003_p5 = scmp.ne.s32.totalorder %s3002_s11, 0 }
 0x39c   : > { %s1477_s10 = scalar_lea.sflag [#allocation5], %s1476_s13 }
 0x39d   : > { %p1901_p9 = pnand %p3004_p7, %p3003_p5 }
 0x39f   : > { %2151 = dma.done.wait (!%p1901_p9), %s1477_s10, 8192  }
 0x3a0   : > { %2153 = vsyncadd (!%p1901_p9), %s1477_s10, 4294959104  ;;  %s25_s29 = sadd.s32 1, %s2176_s29   ;;  %s3005_s7 = smov %s3012_s24 }
 0x3a1   : > { %p22_p0 = scmp.ge.s32.totalorder %s25_s29, 4   ;;  %s3006_s24 = smov %s2160_s25 }
 0x3a2   : > { %s3007_s25 = smov %s2164_s26  ;;  %s3008_s26 = smov %s2395_s8 }
 0x3a3   : > { %s3009_s27 = smov %s2172_s28  ;;  %s3010_s28 = smov %s3005_s7 }
 0x3a4   :  { %24 = sbr.rel (!%p22_p0) target bundleno = 10 (0xa), region = 109 }
 0x3ab   :  { %1482 = vsyncpa [#allocation4], 1 }
 0x3ac   :  { %1484 = vsyncpa [#allocation4 + $0x1], 1 }
 0x3ad   :  { %1485 = vsyncpa [#allocation7], 1 }
 0x3ae   :  { %1486 = vsyncpa [#allocation10], 1 }
 0x3af   :  { %1487 = vsyncpa [#allocation5], 1 }
 0x3b0   :  { %1489 = vsyncpa [#allocation5 + $0x1], 1 }

</bundles_post_ra>
